<compile_context>
chip_gen: v7x
topology: tpu7x:2x2x1
jax: 0.10.0
libtpu: 0.0.40
codegen_flags: <defaults>
</compile_context>

<pallas_src>
from functools import partial

import jax
import jax.numpy as jnp
from jax.experimental import pallas as pl
from jax.experimental.pallas import tpu as pltpu

_LANE = 128


def _attention_mil_kernel(h_ref, w1_ref, b1_ref, w2_ref, wc_ref, bc_ref, y_ref,
                          *, gelu_approx):
    # h_ref block: (TB, N, L); weights full-resident in VMEM (constant index_map, so
    # they are DMA'd once and reused across all grid steps).
    TB, N, L = h_ref.shape
    Dp = w1_ref.shape[1]                                  # padded D
    h = h_ref[...]                                        # (TB, N, L), compute dtype

    # --- attention MLP: all TB bags fused into one MXU matmul (f32 accumulate) -------
    hidden = jnp.dot(h.reshape(TB * N, L), w1_ref[...],
                     preferred_element_type=jnp.float32) + b1_ref[...]    # (TB*N, Dp)
    if gelu_approx:
        # tanh-approx GELU: single EUP tanh per element (v5e VALU-relief option).
        c = jnp.float32(0.7978845608028654)               # sqrt(2/pi)
        hidden = 0.5 * hidden * (
            1.0 + jnp.tanh(c * (hidden + 0.044715 * hidden * hidden * hidden)))
    else:
        # exact GELU (PyTorch nn.GELU default): 0.5*x*(1+erf(x/sqrt(2)))
        inv_sqrt2 = jnp.float32(0.7071067811865476)
        hidden = 0.5 * hidden * (1.0 + jax.lax.erf(hidden * inv_sqrt2))
    hidden = hidden.reshape(TB, N, Dp)                    # layout-preserving un-flatten

    # --- scores: (N,D)@(D,1) replaced by VPU multiply + cross-lane (XLU) reduce ------
    # (b2 bias dropped: softmax is shift-invariant, so it has zero effect.)
    w2_row = w2_ref[...].reshape(1, 1, Dp)
    scores = jnp.sum(hidden * w2_row, axis=-1, keepdims=True)             # (TB, N, 1)

    # --- softmax over the N instances of each bag -------------------------------------
    m = jnp.max(scores, axis=1, keepdims=True)            # (TB, 1, 1)
    e = jnp.exp(scores - m)                               # (TB, N, 1)
    denom = jnp.sum(e, axis=1, keepdims=True)             # (TB, 1, 1)
    # denom holds only TB scalars; keep the exact reciprocal for the strict f32 check.
    a = e * pl.reciprocal(denom, approx=False)            # (TB, N, 1), f32

    # --- M = A @ H (weighted sum over instances), then classifier ---------------------
    # No explicit astype: the multiply promotes the (bf16) h tile without a separate
    # materialized f32 copy of the whole (TB, N, L) block.
    M = jnp.sum(a * h, axis=1)                            # (TB, L), f32
    y = jnp.dot(M.astype(wc_ref.dtype), wc_ref[...],
                preferred_element_type=jnp.float32) + bc_ref[...]         # (TB, Cp)
    y_ref[...] = y.astype(y_ref.dtype)


def _round_up(v, m):
    return ((v + m - 1) // m) * m


def _vmem_capacity_bytes():
    """Physical VMEM of the local TPU generation; conservative v7x default on failure."""
    try:
        cap = int(getattr(pltpu.get_tpu_info(), "vmem_capacity_bytes"))
        if cap > 0:
            return cap
    except Exception:
        pass
    return 64 * 1024 * 1024


def _step_footprint(tb, n, l, dp, cp, h_item, w_item):
    """Conservative per-step VMEM bytes for a (tb, n, l) H tile."""
    h_tile = 2 * tb * n * l * h_item                    # double-buffered H input
    out_tile = 2 * tb * cp * 4                          # double-buffered f32 output
    weights = 2 * ((l * dp + l * cp) * w_item           # w1, wc (2x = worst case if the
                   + (2 * dp + cp) * 4)                 #   single-buffer request is dropped)
    hidden = 2 * tb * n * dp * 4                        # f32 hidden + GELU temporary
    wsum = tb * n * l * 4                               # f32 a*h product
    scores = 3 * tb * n * _LANE * 4                     # scores / exp / softmax temps
    return h_tile + out_tile + weights + hidden + wsum + scores


def _pick_tb(bs, n, l, dp, cp, h_item, w_item, budget_bytes):
    """Largest divisor of bs whose full per-step footprint fits the budget, preferring
    TB % 8 == 0 (sublane-dense output stores) and an even number of grid steps
    (balanced work across the two v7x TensorCores)."""
    cands = [tb for tb in range(1, bs + 1)
             if bs % tb == 0
             and _step_footprint(tb, n, l, dp, cp, h_item, w_item) <= budget_bytes]
    if not cands:
        return 1
    tiers = [
        lambda tb: tb % 8 == 0 and (bs // tb) >= 2 and (bs // tb) % 2 == 0,
        lambda tb: tb % 8 == 0 and (bs // tb) >= 2,
        lambda tb: (bs // tb) >= 2 and (bs // tb) % 2 == 0,
        lambda tb: (bs // tb) >= 2,
    ]
    for pred in tiers:
        tier = [tb for tb in cands if pred(tb)]
        if tier:
            return max(tier)
    return max(cands)


def _default_compute_dtype():
    # bf16 is native on the MXU of all current generations (v5e/v6e/v7x) and halves
    # the H DMA / VMEM footprint; f32 accumulation keeps the math well conditioned.
    try:
        if jax.devices()[0].platform == "tpu":
            return jnp.bfloat16
    except Exception:
        pass
    return jnp.float32


def attention_forward(x, bs, params, *, compute_dtype=None, gelu_approx=False):
    """x: (bs*N, L).  Returns (bs, classes) in float32."""
    if compute_dtype is None:
        compute_dtype = _default_compute_dtype()

    L, D = params["w1"].shape
    classes = params["wc"].shape[1]
    assert x.shape[0] % bs == 0, "x rows must be divisible by bs (bags of equal size)"
    N = x.shape[0] // bs
    assert x.shape == (bs * N, L)

    Dp = _round_up(D, _LANE)
    Cp = _round_up(classes, _LANE)

    w_dtype = jnp.dtype(compute_dtype)
    H = x.reshape(bs, N, L).astype(w_dtype)               # H = x.view(bs, -1, L)

    # One-time weight padding to lane-dense widths (zero pads cannot change results:
    # padded D columns produce GELU(0)=0 and multiply a zero w2 entry; padded class
    # columns are sliced off below).  Biases stay f32.
    w1p = jnp.pad(params["w1"], ((0, 0), (0, Dp - D))).astype(w_dtype)           # (L, Dp)
    b1p = jnp.pad(params["b1"], ((0, 0), (0, Dp - D))).astype(jnp.float32)       # (1, Dp)
    w2p = jnp.pad(params["w2"].reshape(1, D), ((0, 0), (0, Dp - D))
                  ).astype(jnp.float32)                                          # (1, Dp)
    wcp = jnp.pad(params["wc"], ((0, 0), (0, Cp - classes))).astype(w_dtype)     # (L, Cp)
    bcp = jnp.pad(params["bc"], ((0, 0), (0, Cp - classes))).astype(jnp.float32) # (1, Cp)

    itemsize = w_dtype.itemsize
    cap = _vmem_capacity_bytes()
    # Generation-aware footprint budget: ~3/4 of 64 MiB on v7x, ~half of 128 MiB on
    # v5e/v6e (bigger TB amortizes the ~0.35 us per-step pipeline overhead).
    budget = 64 * 1024 * 1024 if cap >= 96 * 1024 * 1024 else 48 * 1024 * 1024
    TB = _pick_tb(bs, N, L, Dp, Cp, itemsize, itemsize, budget)

    # Accurate scoped-VMEM request: estimate (already includes double-buffering) plus a
    # fixed headroom, clamped below the generation's physical capacity.
    est = _step_footprint(TB, N, L, Dp, Cp, itemsize, itemsize)
    vmem_limit = int(min(cap - 4 * 1024 * 1024,
                         max(16 * 1024 * 1024, est + 4 * 1024 * 1024)))

    kernel = partial(_attention_mil_kernel, gelu_approx=gelu_approx)

    def _build(single_buffer_weights):
        def w_spec(shape):
            nd = len(shape)
            kwargs = {}
            if single_buffer_weights:
                # Grid-invariant inputs: one VMEM buffer instead of two.
                kwargs["pipeline_mode"] = pl.Buffered(1)
            return pl.BlockSpec(shape, lambda b, _nd=nd: (0,) * _nd, **kwargs)

        return pl.pallas_call(
            kernel,
            out_shape=jax.ShapeDtypeStruct((bs, Cp), jnp.float32),
            grid_spec=pltpu.PrefetchScalarGridSpec(
                num_scalar_prefetch=0,
                grid=(bs // TB,),
                in_specs=[
                    pl.BlockSpec((TB, N, L), lambda b: (b, 0, 0)),   # H, TB bags / step
                    w_spec((L, Dp)),                                 # w1
                    w_spec((1, Dp)),                                 # b1
                    w_spec((1, Dp)),                                 # w2 (as a row)
                    w_spec((L, Cp)),                                 # wc
                    w_spec((1, Cp)),                                 # bc
                ],
                out_specs=pl.BlockSpec((TB, Cp), lambda b: (b, 0)),
            ),
            compiler_params=pltpu.CompilerParams(
                dimension_semantics=("parallel",),
                vmem_limit_bytes=vmem_limit),
        )

    try:
        out = _build(single_buffer_weights=True)(H, w1p, b1p, w2p, wcp, bcp)
        out = jax.block_until_ready(out)
    except Exception:
        # Fallback for JAX versions that reject pipeline_mode=pl.Buffered(1); default
        # double-buffering of the (small) weights is only a VMEM cost, not a correctness one.
        out = _build(single_buffer_weights=False)(H, w1p, b1p, w2p, wcp, bcp)

    return out[:, :classes]                                # == Y_prob.view(bs, -1)


def init_params(key, L, D, classes):
    # deterministic synthetic init (stands in for initialize_weights)
    k1, k2, k3, k4, k5, k6 = jax.random.split(key, 6)
    scale1 = 1.0 / jnp.sqrt(L)
    scale2 = 1.0 / jnp.sqrt(D)
    return {
        "w1": jax.random.normal(k1, (L, D), jnp.float32) * scale1,
        "b1": jax.random.normal(k2, (1, D), jnp.float32) * 0.01,
        "w2": jax.random.normal(k3, (D, 1), jnp.float32) * scale2,
        "b2": jax.random.normal(k4, (1, 1), jnp.float32) * 0.01,   # no-op under softmax
        "wc": jax.random.normal(k5, (L, classes), jnp.float32) * scale1,
        "bc": jax.random.normal(k6, (1, classes), jnp.float32) * 0.01,
    }


def _reference(x, bs, params):
    # pure-JAX reference of the PyTorch forward (keeps b2, which cancels in softmax)
    L = params["w1"].shape[0]
    H = x.reshape(bs, -1, L)
    hid = H @ params["w1"] + params["b1"]
    hid = 0.5 * hid * (1.0 + jax.lax.erf(hid / jnp.sqrt(2.0)))
    A = hid @ params["w2"] + params["b2"]            # (bs, N, 1)
    A = jnp.swapaxes(A, -1, -2)                      # (bs, 1, N)
    A = jax.nn.softmax(A, axis=-1)
    M = (A @ H)[:, 0, :]                             # (bs, L)
    return M @ params["wc"] + params["bc"]           # (bs, classes)


if __name__ == "__main__":
    bs, N, L, D, classes = 16, 16, 32, 16, 4         # small demo shapes
    key = jax.random.PRNGKey(0)
    kx, kp = jax.random.split(key)
    x = jax.random.normal(kx, (bs * N, L), jnp.float32)
    params = init_params(kp, L, D, classes)
    y_ref = _reference(x, bs, params)

    # Default (bf16 on TPU) path: looser tolerance commensurate with bf16 inputs.
    y_fast = jax.block_until_ready(attention_forward(x, bs, params))
    assert y_fast.shape == (bs, classes)
    assert jnp.allclose(y_fast, y_ref, atol=5e-2, rtol=5e-2), (y_fast, y_ref)

    # f32 path: strict check against the reference.
    y_f32 = jax.block_until_ready(
        attention_forward(x, bs, params, compute_dtype=jnp.float32))
    assert y_f32.shape == (bs, classes)
    assert jnp.allclose(y_f32, y_ref, atol=1e-4, rtol=1e-4), (y_f32, y_ref)

    print("KERNEL_OK")
</pallas_src>

<mosaic_0001>
module attributes {stable_mosaic.version = 11 : i64} {
  func.func @_attention_mil_kernel(%arg0: i32, %arg1: memref<8x16x32xf32, #tpu.memory_space<vmem>>, %arg2: memref<32x128xf32, #tpu.memory_space<vmem>>, %arg3: memref<1x128xf32, #tpu.memory_space<vmem>>, %arg4: memref<1x128xf32, #tpu.memory_space<vmem>>, %arg5: memref<32x128xf32, #tpu.memory_space<vmem>>, %arg6: memref<1x128xf32, #tpu.memory_space<vmem>>, %arg7: memref<8x128xf32, #tpu.memory_space<vmem>>) attributes {dimension_semantics = [#tpu.dimension_semantics<parallel>], iteration_bounds = array<i64: 2>, scalar_prefetch = 0 : i64, scratch_operands = 0 : i64, tpu.core_type = #tpu.core_type<tc>, window_params = [{transform_indices = @transform_0, window_bounds = array<i64: 8, 16, 32>}, {pipeline_mode = #tpu.pipeline_mode<synchronous>, transform_indices = @transform_1, window_bounds = array<i64: 32, 128>}, {pipeline_mode = #tpu.pipeline_mode<synchronous>, transform_indices = @transform_2, window_bounds = array<i64: 1, 128>}, {pipeline_mode = #tpu.pipeline_mode<synchronous>, transform_indices = @transform_3, window_bounds = array<i64: 1, 128>}, {pipeline_mode = #tpu.pipeline_mode<synchronous>, transform_indices = @transform_4, window_bounds = array<i64: 32, 128>}, {pipeline_mode = #tpu.pipeline_mode<synchronous>, transform_indices = @transform_5, window_bounds = array<i64: 1, 128>}, {transform_indices = @transform_6, window_bounds = array<i64: 8, 128>}]} {
    %c0 = arith.constant 0 : index
    %c0_0 = arith.constant 0 : index
    %c0_1 = arith.constant 0 : index
    %0 = vector.load %arg1[%c0, %c0_0, %c0_1] : memref<8x16x32xf32, #tpu.memory_space<vmem>>, vector<8x16x32xf32>
    %1 = vector.shape_cast %0 : vector<8x16x32xf32> to vector<128x32xf32>
    %c0_2 = arith.constant 0 : index
    %c0_3 = arith.constant 0 : index
    %2 = vector.load %arg2[%c0_2, %c0_3] : memref<32x128xf32, #tpu.memory_space<vmem>>, vector<32x128xf32>
    %cst = arith.constant dense<0.000000e+00> : vector<128x128xf32>
    %3 = tpu.matmul %1, %2, %cst {dimension_numbers = #tpu.dot_dimension_numbers<[1], [0], [0], [1], [0, 0, 1, 1], [], []>} : vector<128x32xf32>, vector<32x128xf32>, vector<128x128xf32> -> vector<128x128xf32>
    %c0_4 = arith.constant 0 : index
    %c0_5 = arith.constant 0 : index
    %4 = vector.load %arg3[%c0_4, %c0_5] : memref<1x128xf32, #tpu.memory_space<vmem>>, vector<1x128xf32>
    %5 = vector.broadcast %4 : vector<1x128xf32> to vector<128x128xf32>
    %6 = arith.addf %3, %5 : vector<128x128xf32>
    %cst_6 = arith.constant 5.000000e-01 : f32
    %7 = vector.broadcast %cst_6 : f32 to vector<128x128xf32>
    %8 = arith.mulf %7, %6 : vector<128x128xf32>
    %cst_7 = arith.constant 0.707106769 : f32
    %9 = vector.broadcast %cst_7 : f32 to vector<128x128xf32>
    %10 = arith.mulf %6, %9 : vector<128x128xf32>
    %11 = math.erf %10 : vector<128x128xf32>
    %cst_8 = arith.constant 1.000000e+00 : f32
    %12 = vector.broadcast %cst_8 : f32 to vector<128x128xf32>
    %13 = arith.addf %12, %11 : vector<128x128xf32>
    %14 = arith.mulf %8, %13 : vector<128x128xf32>
    %15 = vector.shape_cast %14 : vector<128x128xf32> to vector<8x16x128xf32>
    %c0_9 = arith.constant 0 : index
    %c0_10 = arith.constant 0 : index
    %16 = vector.load %arg4[%c0_9, %c0_10] : memref<1x128xf32, #tpu.memory_space<vmem>>, vector<1x128xf32>
    %17 = vector.shape_cast %16 : vector<1x128xf32> to vector<1x1x128xf32>
    %18 = vector.broadcast %17 : vector<1x1x128xf32> to vector<8x16x128xf32>
    %19 = arith.mulf %15, %18 : vector<8x16x128xf32>
    %cst_11 = arith.constant dense<0.000000e+00> : vector<8x16xf32>
    %20 = vector.multi_reduction <add>, %19, %cst_11 [2] : vector<8x16x128xf32> to vector<8x16xf32>
    %21 = vector.shape_cast %20 : vector<8x16xf32> to vector<8x16x1xf32>
    %cst_12 = arith.constant dense<0xFF800000> : vector<8x1xf32>
    %22 = vector.multi_reduction <maximumf>, %21, %cst_12 [1] : vector<8x16x1xf32> to vector<8x1xf32>
    %23 = vector.shape_cast %22 : vector<8x1xf32> to vector<8x1x1xf32>
    %24 = vector.broadcast %23 : vector<8x1x1xf32> to vector<8x16x1xf32>
    %25 = arith.subf %21, %24 : vector<8x16x1xf32>
    %26 = math.exp %25 : vector<8x16x1xf32>
    %cst_13 = arith.constant dense<0.000000e+00> : vector<8x1xf32>
    %27 = vector.multi_reduction <add>, %26, %cst_13 [1] : vector<8x16x1xf32> to vector<8x1xf32>
    %28 = vector.shape_cast %27 : vector<8x1xf32> to vector<8x1x1xf32>
    %29 = tpu.reciprocal %28 : vector<8x1x1xf32> -> vector<8x1x1xf32>
    %30 = vector.broadcast %29 : vector<8x1x1xf32> to vector<8x16x1xf32>
    %31 = arith.mulf %26, %30 : vector<8x16x1xf32>
    %32 = vector.broadcast %31 : vector<8x16x1xf32> to vector<8x16x32xf32>
    %33 = arith.mulf %32, %0 : vector<8x16x32xf32>
    %cst_14 = arith.constant dense<0.000000e+00> : vector<8x32xf32>
    %34 = vector.multi_reduction <add>, %33, %cst_14 [1] : vector<8x16x32xf32> to vector<8x32xf32>
    %c0_15 = arith.constant 0 : index
    %c0_16 = arith.constant 0 : index
    %35 = vector.load %arg5[%c0_15, %c0_16] : memref<32x128xf32, #tpu.memory_space<vmem>>, vector<32x128xf32>
    %cst_17 = arith.constant dense<0.000000e+00> : vector<8x128xf32>
    %36 = tpu.matmul %34, %35, %cst_17 {dimension_numbers = #tpu.dot_dimension_numbers<[1], [0], [0], [1], [0, 0, 1, 1], [], []>} : vector<8x32xf32>, vector<32x128xf32>, vector<8x128xf32> -> vector<8x128xf32>
    %c0_18 = arith.constant 0 : index
    %c0_19 = arith.constant 0 : index
    %37 = vector.load %arg6[%c0_18, %c0_19] : memref<1x128xf32, #tpu.memory_space<vmem>>, vector<1x128xf32>
    %38 = vector.broadcast %37 : vector<1x128xf32> to vector<8x128xf32>
    %39 = arith.addf %36, %38 : vector<8x128xf32>
    %c0_20 = arith.constant 0 : index
    %c0_21 = arith.constant 0 : index
    %40 = vector.load %arg7[%c0_20, %c0_21] : memref<8x128xf32, #tpu.memory_space<vmem>>, vector<8x128xf32>
    tpu.vector_store %arg7[%c0_20, %c0_21], %39 {strides = array<i32>} : memref<8x128xf32, #tpu.memory_space<vmem>>, vector<8x128xf32>,
    return
  }
  func.func @transform_0(%arg0: i32) -> (i32, i32, i32) {
    %c0_i32 = arith.constant 0 : i32
    %c0_i32_0 = arith.constant 0 : i32
    %c0_i32_1 = arith.constant 0 : i32
    return %arg0, %c0_i32, %c0_i32_0 : i32, i32, i32
  }
  func.func @transform_1(%arg0: i32) -> (i32, i32) {
    %c0_i32 = arith.constant 0 : i32
    %c0_i32_0 = arith.constant 0 : i32
    %c0_i32_1 = arith.constant 0 : i32
    return %c0_i32, %c0_i32_0 : i32, i32
  }
  func.func @transform_2(%arg0: i32) -> (i32, i32) {
    %c0_i32 = arith.constant 0 : i32
    %c0_i32_0 = arith.constant 0 : i32
    %c0_i32_1 = arith.constant 0 : i32
    return %c0_i32, %c0_i32_0 : i32, i32
  }
  func.func @transform_3(%arg0: i32) -> (i32, i32) {
    %c0_i32 = arith.constant 0 : i32
    %c0_i32_0 = arith.constant 0 : i32
    %c0_i32_1 = arith.constant 0 : i32
    return %c0_i32, %c0_i32_0 : i32, i32
  }
  func.func @transform_4(%arg0: i32) -> (i32, i32) {
    %c0_i32 = arith.constant 0 : i32
    %c0_i32_0 = arith.constant 0 : i32
    %c0_i32_1 = arith.constant 0 : i32
    return %c0_i32, %c0_i32_0 : i32, i32
  }
  func.func @transform_5(%arg0: i32) -> (i32, i32) {
    %c0_i32 = arith.constant 0 : i32
    %c0_i32_0 = arith.constant 0 : i32
    %c0_i32_1 = arith.constant 0 : i32
    return %c0_i32, %c0_i32_0 : i32, i32
  }
  func.func @transform_6(%arg0: i32) -> (i32, i32) {
    %c0_i32 = arith.constant 0 : i32
    %c0_i32_0 = arith.constant 0 : i32
    return %arg0, %c0_i32 : i32, i32
  }
}

module attributes {stable_mosaic.version = 11 : i64} {
  func.func @_attention_mil_kernel(%arg0: i32, %arg1: memref<8x16x32xf32, #tpu.memory_space<vmem>>, %arg2: memref<32x128xf32, #tpu.memory_space<vmem>>, %arg3: memref<1x128xf32, #tpu.memory_space<vmem>>, %arg4: memref<1x128xf32, #tpu.memory_space<vmem>>, %arg5: memref<32x128xf32, #tpu.memory_space<vmem>>, %arg6: memref<1x128xf32, #tpu.memory_space<vmem>>, %arg7: memref<8x128xf32, #tpu.memory_space<vmem>>) attributes {dimension_semantics = [#tpu.dimension_semantics<parallel>], iteration_bounds = array<i64: 2>, scalar_prefetch = 0 : i64, scratch_operands = 0 : i64, tpu.core_type = #tpu.core_type<tc>, window_params = [{transform_indices = @transform_0, window_bounds = array<i64: 8, 16, 32>}, {pipeline_mode = #tpu.pipeline_mode<synchronous>, transform_indices = @transform_1, window_bounds = array<i64: 32, 128>}, {pipeline_mode = #tpu.pipeline_mode<synchronous>, transform_indices = @transform_2, window_bounds = array<i64: 1, 128>}, {pipeline_mode = #tpu.pipeline_mode<synchronous>, transform_indices = @transform_3, window_bounds = array<i64: 1, 128>}, {pipeline_mode = #tpu.pipeline_mode<synchronous>, transform_indices = @transform_4, window_bounds = array<i64: 32, 128>}, {pipeline_mode = #tpu.pipeline_mode<synchronous>, transform_indices = @transform_5, window_bounds = array<i64: 1, 128>}, {transform_indices = @transform_6, window_bounds = array<i64: 8, 128>}]} {
    %c0 = arith.constant 0 : index
    %c0_0 = arith.constant 0 : index
    %c0_1 = arith.constant 0 : index
    %0 = vector.load %arg1[%c0, %c0_0, %c0_1] : memref<8x16x32xf32, #tpu.memory_space<vmem>>, vector<8x16x32xf32>
    %1 = vector.shape_cast %0 : vector<8x16x32xf32> to vector<128x32xf32>
    %c0_2 = arith.constant 0 : index
    %c0_3 = arith.constant 0 : index
    %2 = vector.load %arg2[%c0_2, %c0_3] : memref<32x128xf32, #tpu.memory_space<vmem>>, vector<32x128xf32>
    %cst = arith.constant dense<0.000000e+00> : vector<128x128xf32>
    %3 = tpu.matmul %1, %2, %cst {dimension_numbers = #tpu.dot_dimension_numbers<[1], [0], [0], [1], [0, 0, 1, 1], [], []>} : vector<128x32xf32>, vector<32x128xf32>, vector<128x128xf32> -> vector<128x128xf32>
    %c0_4 = arith.constant 0 : index
    %c0_5 = arith.constant 0 : index
    %4 = vector.load %arg3[%c0_4, %c0_5] : memref<1x128xf32, #tpu.memory_space<vmem>>, vector<1x128xf32>
    %5 = vector.broadcast %4 : vector<1x128xf32> to vector<128x128xf32>
    %6 = arith.addf %3, %5 : vector<128x128xf32>
    %cst_6 = arith.constant 5.000000e-01 : f32
    %7 = vector.broadcast %cst_6 : f32 to vector<128x128xf32>
    %8 = arith.mulf %7, %6 : vector<128x128xf32>
    %cst_7 = arith.constant 0.707106769 : f32
    %9 = vector.broadcast %cst_7 : f32 to vector<128x128xf32>
    %10 = arith.mulf %6, %9 : vector<128x128xf32>
    %11 = math.erf %10 : vector<128x128xf32>
    %cst_8 = arith.constant 1.000000e+00 : f32
    %12 = vector.broadcast %cst_8 : f32 to vector<128x128xf32>
    %13 = arith.addf %12, %11 : vector<128x128xf32>
    %14 = arith.mulf %8, %13 : vector<128x128xf32>
    %15 = vector.shape_cast %14 : vector<128x128xf32> to vector<8x16x128xf32>
    %c0_9 = arith.constant 0 : index
    %c0_10 = arith.constant 0 : index
    %16 = vector.load %arg4[%c0_9, %c0_10] : memref<1x128xf32, #tpu.memory_space<vmem>>, vector<1x128xf32>
    %17 = vector.shape_cast %16 : vector<1x128xf32> to vector<1x1x128xf32>
    %18 = vector.broadcast %17 : vector<1x1x128xf32> to vector<8x16x128xf32>
    %19 = arith.mulf %15, %18 : vector<8x16x128xf32>
    %cst_11 = arith.constant dense<0.000000e+00> : vector<8x16xf32>
    %20 = vector.multi_reduction <add>, %19, %cst_11 [2] : vector<8x16x128xf32> to vector<8x16xf32>
    %21 = vector.shape_cast %20 : vector<8x16xf32> to vector<8x16x1xf32>
    %cst_12 = arith.constant dense<0xFF800000> : vector<8x1xf32>
    %22 = vector.multi_reduction <maximumf>, %21, %cst_12 [1] : vector<8x16x1xf32> to vector<8x1xf32>
    %23 = vector.shape_cast %22 : vector<8x1xf32> to vector<8x1x1xf32>
    %24 = vector.broadcast %23 : vector<8x1x1xf32> to vector<8x16x1xf32>
    %25 = arith.subf %21, %24 : vector<8x16x1xf32>
    %26 = math.exp %25 : vector<8x16x1xf32>
    %cst_13 = arith.constant dense<0.000000e+00> : vector<8x1xf32>
    %27 = vector.multi_reduction <add>, %26, %cst_13 [1] : vector<8x16x1xf32> to vector<8x1xf32>
    %28 = vector.shape_cast %27 : vector<8x1xf32> to vector<8x1x1xf32>
    %29 = tpu.reciprocal %28 : vector<8x1x1xf32> -> vector<8x1x1xf32>
    %30 = vector.broadcast %29 : vector<8x1x1xf32> to vector<8x16x1xf32>
    %31 = arith.mulf %26, %30 : vector<8x16x1xf32>
    %32 = vector.broadcast %31 : vector<8x16x1xf32> to vector<8x16x32xf32>
    %33 = arith.mulf %32, %0 : vector<8x16x32xf32>
    %cst_14 = arith.constant dense<0.000000e+00> : vector<8x32xf32>
    %34 = vector.multi_reduction <add>, %33, %cst_14 [1] : vector<8x16x32xf32> to vector<8x32xf32>
    %c0_15 = arith.constant 0 : index
    %c0_16 = arith.constant 0 : index
    %35 = vector.load %arg5[%c0_15, %c0_16] : memref<32x128xf32, #tpu.memory_space<vmem>>, vector<32x128xf32>
    %cst_17 = arith.constant dense<0.000000e+00> : vector<8x128xf32>
    %36 = tpu.matmul %34, %35, %cst_17 {dimension_numbers = #tpu.dot_dimension_numbers<[1], [0], [0], [1], [0, 0, 1, 1], [], []>} : vector<8x32xf32>, vector<32x128xf32>, vector<8x128xf32> -> vector<8x128xf32>
    %c0_18 = arith.constant 0 : index
    %c0_19 = arith.constant 0 : index
    %37 = vector.load %arg6[%c0_18, %c0_19] : memref<1x128xf32, #tpu.memory_space<vmem>>, vector<1x128xf32>
    %38 = vector.broadcast %37 : vector<1x128xf32> to vector<8x128xf32>
    %39 = arith.addf %36, %38 : vector<8x128xf32>
    %c0_20 = arith.constant 0 : index
    %c0_21 = arith.constant 0 : index
    %40 = vector.load %arg7[%c0_20, %c0_21] : memref<8x128xf32, #tpu.memory_space<vmem>>, vector<8x128xf32>
    tpu.vector_store %arg7[%c0_20, %c0_21], %39 {strides = array<i32>} : memref<8x128xf32, #tpu.memory_space<vmem>>, vector<8x128xf32>,
    return
  }
  func.func @transform_0(%arg0: i32) -> (i32, i32, i32) {
    %c0_i32 = arith.constant 0 : i32
    %c0_i32_0 = arith.constant 0 : i32
    %c0_i32_1 = arith.constant 0 : i32
    return %arg0, %c0_i32, %c0_i32_0 : i32, i32, i32
  }
  func.func @transform_1(%arg0: i32) -> (i32, i32) {
    %c0_i32 = arith.constant 0 : i32
    %c0_i32_0 = arith.constant 0 : i32
    %c0_i32_1 = arith.constant 0 : i32
    return %c0_i32, %c0_i32_0 : i32, i32
  }
  func.func @transform_2(%arg0: i32) -> (i32, i32) {
    %c0_i32 = arith.constant 0 : i32
    %c0_i32_0 = arith.constant 0 : i32
    %c0_i32_1 = arith.constant 0 : i32
    return %c0_i32, %c0_i32_0 : i32, i32
  }
  func.func @transform_3(%arg0: i32) -> (i32, i32) {
    %c0_i32 = arith.constant 0 : i32
    %c0_i32_0 = arith.constant 0 : i32
    %c0_i32_1 = arith.constant 0 : i32
    return %c0_i32, %c0_i32_0 : i32, i32
  }
  func.func @transform_4(%arg0: i32) -> (i32, i32) {
    %c0_i32 = arith.constant 0 : i32
    %c0_i32_0 = arith.constant 0 : i32
    %c0_i32_1 = arith.constant 0 : i32
    return %c0_i32, %c0_i32_0 : i32, i32
  }
  func.func @transform_5(%arg0: i32) -> (i32, i32) {
    %c0_i32 = arith.constant 0 : i32
    %c0_i32_0 = arith.constant 0 : i32
    %c0_i32_1 = arith.constant 0 : i32
    return %c0_i32, %c0_i32_0 : i32, i32
  }
  func.func @transform_6(%arg0: i32) -> (i32, i32) {
    %c0_i32 = arith.constant 0 : i32
    %c0_i32_0 = arith.constant 0 : i32
    return %arg0, %c0_i32 : i32, i32
  }
}

</mosaic_0001>

<bundles_post_ra>
// kernel: tpu_custom_call.1
= control target key start
LH: loop header
LB: loop body
LE: loop exit
PB: predicated region body
PF: predicated region fallthrough
CT: control target
= control target key end

     0   :  { %11 = vsyncpa [#allocation3], 0  ;;  %s2168_s0 = inlined_call_operand.hbm [shape: f32[16,16,32], index: 0, kind: input, shape index: {}]   ;;  %s2169_s1 = inlined_call_operand.hbm [shape: f32[32,128], index: 1, kind: input, shape index: {}]   ;;  %s2170_s2 = inlined_call_operand.vmem [shape: f32[1,128], index: 2, kind: input, shape index: {}]   ;;  %s2171_s3 = inlined_call_operand.vmem [shape: f32[1,128], index: 3, kind: input, shape index: {}]   ;;  %s2172_s4 = inlined_call_operand.hbm [shape: f32[32,128], index: 4, kind: input, shape index: {}]   ;;  %s2173_s5 = inlined_call_operand.vmem [shape: f32[1,128], index: 5, kind: input, shape index: {}]   ;;  %s2174_s6 = inlined_call_operand.hbm [shape: f32[16,128], index: 6, kind: output, shape index: {}]  }
   0x1   :  { %13 = vsyncpa [#allocation3 + $0x1], 0 }
   0x2   :  { %14 = vsyncpa [#allocation6], 0 }
   0x3   :  { %15 = vsyncpa [#allocation4], 0 }
   0x4   :  { %17 = vsyncpa [#allocation4 + $0x1], 0  ;;  %s1618_s21 = smov 0   ;;  %s1620_s22 = smov 0  }
   0x5   :  { %s1622_s23 = smov 0   ;;  %s1624_s24 = smov 0  }
   0x6 LB: > { %s1639_s25 = sadd.s32 4294967295, %s1572_s24   ;;  %s1138_s26 = sadd.s32 4294967294, %s1572_s24   ;;  %s1572_s24 = sphi %s1624_s24, %s2194_s24   ;;  %s1568_s23 = sphi %s1622_s23, %s2193_s23   ;;  %s1564_s22 = sphi %s1620_s22, %s2192_s22   ;;  %s1560_s21 = sphi %s1618_s21, %s2191_s21  }
   0x7   : > { %p43_p0 = scmp.ne.s32.totalorder %s1564_s22, %s1560_s21  ;;  %p2175_p1 = scmp.eq.s32.totalorder %s1639_s25, 0 }
   0x8   : > { %p178_p3 = scmp.eq.s32.totalorder %s1138_s26, 1  ;;  %p1139_p5 = scmp.ge.s32.totalorder %s1572_s24, 1 }
   0x9   : > { %p1648_p4 = por %p2175_p1, %p43_p0  ;;  %p185_p7 = scmp.lt.s32.totalorder %s1572_s24, 3 }
   0xa   : > { %p1653_p6 = por %p178_p3, %p43_p0  ;;  %s1574_s30 = smov [#allocation5]  }
   0xb   : > { %s2178_s27 = scalar_select %p1648_p4, 1, 0 }
   0xc   : > { %s2179_s28 = scalar_select %p1653_p6, 1, 0 }
   0xd   : > { %p1658_p8 = pnand %p1139_p5, %p185_p7  ;;  %s197_s7 = sshll.u32 %s1574_s30, 4  ;;  %s1662_s7 = int_to_ptr.vmem [resolvable:$true] %s197_s7 }
   0xe   : > { %s1575_s9 = smov [#allocation7]   ;;  %s1416_s13 = scalar_lea.hbm %s2169_s1, 512 }
   0xf   : > { %p1276_p9 = pneg %p1658_p8  ;;  %s216_s10 = sshll.u32 %s1575_s9, 4  ;;  %s1673_s10 = int_to_ptr.vmem [resolvable:$true] %s216_s10 }
  0x10   : > { %p1417_p12 = scmp.ne.s32.totalorder %s2169_s1, %s1416_s13  ;;  %p1423_p5 = scmp.lt.u32.totalorder %s1416_s13, %s2169_s1 }
  0x11   : > { %p1669_p11 = pnand %p1276_p9, %p2175_p1 }
  0x13   : > { %p1418_p13 = pneg %p1669_p11 }
  0x15   : > { %p1419_p0 = pnand %p1418_p13, %p1417_p12 }
  0x17   : > { %p1420_p3 = pneg %p1419_p0 }
  0x19   : > { %p1425_p7 = pnand %p1423_p5, %p1420_p3 }
  0x1b   : > { %1428 = shalt.err (!%p1425_p7)
}
  0x1c   : > { %s1429_s18 = scalar_lea.vmem %s1662_s7, 512  ;;  %p1437_p2 = scmp.lt.s32.totalorder %s1662_s7, %s1662_s7 }
  0x1d   : > { %p1430_p9 = scmp.ne.s32.totalorder %s1662_s7, %s1429_s18  ;;  %p1438_p12 = scmp.lt.s32.totalorder %s1429_s18, %s1429_s18 }
  0x1f   : > { %p1432_p10 = pnand %p1430_p9, %p1418_p13  ;;  %p1439_p0 = por %p1438_p12, %p1437_p2 }
  0x21   : > { %p1433_p1 = pneg %p1432_p10 }
  0x23   : > { %p1440_p6 = pnand %p1439_p0, %p1433_p1 }
  0x25   : > { %1443 = shalt.err (!%p1440_p6)
}
  0x26   : > { %s1576_s19 = smov 128   ;;  %s1577_s20 = smov 8  }
  0x27   : > { %1279 = dma.hbm_to_vmem [thread:$0]  (!%p1669_p11), %s2169_s1, 512, %s1662_s7, [#allocation6], %s1576_s19, %s1576_s19, %s1577_s20  }
  0x28   : > { %s1444_s12 = scalar_lea.hbm %s2172_s4, 512 }
  0x29   : > { %p1445_p1 = scmp.ne.s32.totalorder %s2172_s4, %s1444_s12  ;;  %p1451_p10 = scmp.lt.u32.totalorder %s1444_s12, %s2172_s4 }
  0x2b   : > { %p1447_p2 = pnand %p1445_p1, %p1418_p13 }
  0x2d   : > { %p1448_p6 = pneg %p1447_p2 }
  0x2f   : > { %p1453_p3 = pnand %p1451_p10, %p1448_p6 }
  0x31   : > { %1456 = shalt.err (!%p1453_p3)
}
  0x32   : > { %s1457_s7 = scalar_lea.vmem %s1673_s10, 512  ;;  %p1465_p12 = scmp.lt.s32.totalorder %s1673_s10, %s1673_s10 }
  0x33   : > { %p1458_p5 = scmp.ne.s32.totalorder %s1673_s10, %s1457_s7  ;;  %p1466_p0 = scmp.lt.s32.totalorder %s1457_s7, %s1457_s7 }
  0x35   : > { %p1460_p7 = pnand %p1458_p5, %p1418_p13  ;;  %p1467_p1 = por %p1466_p0, %p1465_p12 }
  0x37   : > { %p1461_p9 = pneg %p1460_p7 }
  0x39   : > { %p1468_p2 = pnand %p1467_p1, %p1461_p9 }
  0x3b   : > { %1471 = shalt.err (!%p1468_p2)
}
  0x3c   : > { %1282 = dma.hbm_to_vmem [thread:$0]  (!%p1669_p11), %s2172_s4, 512, %s1673_s10, [#allocation6], %s1576_s19, %s1576_s19, %s1577_s20  }
  0x3d   : > { %s1734_s8 = sadd.s32 1, %s1572_s24   ;;  %s30_s26 = sadd.s32 1, %s1568_s23 }
  0x3e   : > { %s27_s30 = ssub.s32 %s1572_s24, %s1734_s8  ;;  %p37_p13 = scmp.ne.s32.totalorder %s1568_s23, %s1564_s22 }
  0x3f   : > { %p28_p6 = scmp.eq.s32.totalorder %s27_s30, 0  ;;  %p38_p10 = scmp.eq.s32.totalorder %s1572_s24, 0 }
  0x40   : > { %p2182_p3 = scmp.eq.s32.totalorder %s1639_s25, 1  ;;  %p1293_p7 = scmp.lt.s32.totalorder %s1572_s24, 2 }
  0x41   : > { %s1750_s11 = scalar_select %p28_p6, %s1568_s23, %s30_s26  }
  0x42   : > { %p1744_p5 = por %p2182_p3, %p37_p13  ;;  %p39_p9 = por %p38_p10, %p37_p13 }
  0x43   : > { %s233_s12 = sand.u32 1, %s1568_s23   ;;  %s1177_s10 = sshll.u32 %s1572_s24, 11 }
  0x44   : > { %s2183_s9 = scalar_select %p1744_p5, 1, 0 }
  0x45   : > { %s1143_s13 = sshll.u32 %s233_s12, 7  ;;  %s1757_s16 = scalar_lea.hbm %s2168_s0, %s1177_s10 }
  0x46   : > { %s237_s7 = scalar_lea.vmem [#allocation2], %s1143_s13  ;;  %p1761_p11 = pnand %p1293_p7, %p39_p9 }
  0x47   : > { %s245_s17 = sshll.u32 %s237_s7, 4  ;;  %s1765_s26 = scalar_lea.sflag [#allocation3], %s233_s12  ;;  %s1759_s17 = int_to_ptr.vmem [resolvable:$true] %s245_s17 }
  0x48   : > { %s1472_s30 = scalar_lea.hbm %s1757_s16, 2048  ;;  %p1474_p0 = pneg %p1761_p11 }
  0x49   : > { %p1473_p12 = scmp.ne.s32.totalorder %s1757_s16, %s1472_s30  ;;  %s1477_s14 = scalar_lea.hbm %s2168_s0, 4096 }
  0x4a   : > { %p1478_p13 = scmp.lt.u32.totalorder %s1757_s16, %s2168_s0  ;;  %p1479_p6 = scmp.lt.u32.totalorder %s1477_s14, %s1472_s30 }
  0x4b   : > { %p1475_p1 = pnand %p1474_p0, %p1473_p12  ;;  %p1481_p3 = scmp.lt.u32.totalorder %s1472_s30, %s1757_s16 }
  0x4c   : > { %p1480_p10 = por %p1479_p6, %p1478_p13 }
  0x4d   : > { %p1476_p2 = pneg %p1475_p1 }
  0x4e   : > { %p1482_p7 = por %p1481_p3, %p1480_p10 }
  0x50   : > { %p1483_p9 = pnand %p1482_p7, %p1476_p2 }
  0x52   : > { %1486 = shalt.err (!%p1483_p9)
}
  0x53   : > { %s1487_s12 = scalar_lea.vmem %s1759_s17, 2048  ;;  %s1578_s13 = smov [#allocation2]  }
  0x54   : > { %p1488_p12 = scmp.ne.s32.totalorder %s1759_s17, %s1487_s12  ;;  %s1492_s10 = sshll.u32 %s1578_s13, 4  ;;  %s1493_s10 = int_to_ptr.vmem [resolvable:$false] %s1492_s10 }
  0x55   : > { %s1494_s15 = scalar_lea.vmem %s1493_s10, 4096  ;;  %p1495_p4 = scmp.lt.s32.totalorder %s1759_s17, %s1493_s10 }
  0x56   : > { %p1490_p1 = pnand %p1488_p12, %p1474_p0  ;;  %p1496_p13 = scmp.lt.s32.totalorder %s1494_s15, %s1487_s12 }
  0x58   : > { %p1491_p5 = pneg %p1490_p1  ;;  %p1497_p6 = por %p1496_p13, %p1495_p4 }
  0x5a   : > { %p1498_p10 = pnand %p1497_p6, %p1491_p5 }
  0x5c   : > { %1501 = shalt.err (!%p1498_p10)
}
  0x5d   : > { %1286 = dma.hbm_to_vmem [thread:$0]  (!%p1761_p11), %s1757_s16, 2048, %s1759_s17, %s1765_s26, %s1576_s19, %s1576_s19, %s1577_s20  }
  0x5e   : > { %257 = sbr.rel (%p1658_p8) target bundleno = 826 (0x33a), region = 44  ;;  %s1799_s30 = sand.u32 (!%p1658_p8), 1, %s1564_s22  }
  0x5f   : > { %s1148_s14 = sshll.u32 (!%p1658_p8), %s1799_s30, 7  ;;  %s260_s7 = scalar_lea.sflag (!%p1658_p8), [#allocation3], %s1799_s30 }
  0x60   : > { %s1803_s12 = scalar_lea.vmem (!%p1658_p8), [#allocation2], %s1148_s14  ;;  %p2185_p4 = scmp.ne.s32.totalorder (!%p1658_p8), %s2178_s27, 0 }
  0x65   : > { %1547 = dma.done.wait (%p2185_p4), %s260_s7, 2048  }
  0x66   : > { %1549 = vsyncadd (%p2185_p4), %s260_s7, 4294965248  ;;  %p2186_p5 = scmp.eq.s32.totalorder %s1639_s25, 0 }
  0x68   : > { %1551 = dma.done.wait (%p2186_p5), [#allocation6], 1024   ;;  %p2187_p8 = pmov %p2186_p5 }
  0x69   : > { %vm328_vm0 = vcmask 261120   ;;  %v317_v0 = vld [vmem:[#allocation5] sm:$0xff]  ;;  %v318_v1 = vld [vmem:[#allocation5 + $0x8] sm:$0xff]  ;;  %v319_v2 = vld [vmem:[#allocation5 + $0x10] sm:$0xff]  ;;  %vm1580_vm1 = vmmov 0   ;;  %vm948_vm2 = vcmask 1041409  }
  0x6a   : > { %1553 = vsyncadd (%p2187_p8), [#allocation6], 4294966272  ;;  %v1246_v3 = vpack.c.bf16 %v318_v1, %v317_v0  ;;  %v320_v4 = vld [vmem:[#allocation5 + $0x18] sm:$0xff]  ;;  %v1814_v5 = vld [vmem:[%s1803_s12] sm:$0xff]  ;;  %vm950_vm3 = vcmask 1042434   ;;  %vm952_vm4 = vcmask 1043459  }
  0x6b   : > { %v1817_v6 = vld [vmem:[%s1803_s12 + $0x50] sm:$0xff]  ;;  %v1250_v7 = vpack.c.bf16 %v320_v4, %v319_v2  ;;  %1211 = vmatprep.mubr.msk.f32.mxu0 %vm328_vm0, %v1814_v5  ;;  %v1824_v8 = vld [vmem:[%s1803_s12 + $0x8] sm:$0xff]  ;;  %v1827_v9 = vld [vmem:[%s1803_s12 + $0x58] sm:$0xff]  ;;  %vm954_vm5 = vcmask 1044484   ;;  %vm956_vm6 = vcmask 1045509   ;;  %vm958_vm7 = vcmask 1046534  }
  0x6c   : > { %1226 = vmatprep.mubr.msk.f32.mxu1 %vm328_vm0, %v1817_v6  ;;  %1247 = vmatprep.subr.bf16.mxu0 %v1246_v3  ;;  %v1830_v10 = vld [vmem:[%s1803_s12 + $0x10] sm:$0xff]  ;;  %v1833_v11 = vld [vmem:[%s1803_s12 + $0x60] sm:$0xff]  ;;  %v1844_v12 = vld [vmem:[%s1803_s12 + $0x18] sm:$0xff]  ;;  %vm960_vm8 = vcmask 1047559   ;;  %s1151_s16 = sshll.u32 %s1799_s30, 3  ;;  %s1173_s26 = sshll.u32 %s1639_s25, 7 }
  0x6d   : > { %1260 = vmatprep.subr.bf16.mxu1 %v1246_v3  ;;  %1249 = vmatpush3.bf16.msra.mxu0 %v1246_v3  ;;  %v1847_v13 = vld [vmem:[%s1803_s12 + $0x68] sm:$0xff]  ;;  %v1850_v14 = vld [vmem:[%s1803_s12 + $0x20] sm:$0xff]  ;;  %v1853_v15 = vld [vmem:[%s1803_s12 + $0x70] sm:$0xff]  ;;  %s299_s13 = scalar_lea.vmem [#allocation8], %s1151_s16  ;;  %s2124_s7 = scalar_lea.hbm %s2174_s6, %s1173_s26 }
  0x6e   : > { %1262 = vmatpush3.bf16.msra.mxu1 %v1246_v3  ;;  %1251 = vmatprep.subr.bf16.mxu0 %v1250_v7  ;;  %v1862_v16 = vld [vmem:[%s1803_s12 + $0x28] sm:$0xff]  ;;  %v1867_v17 = vld [vmem:[%s1803_s12 + $0x78] sm:$0xff]  ;;  %v1870_v18 = vld [vmem:[%s1803_s12 + $0x30] sm:$0xff]  ;;  %s1049_s10 = sshll.u32 %s299_s13, 4  ;;  %p2188_p0 = scmp.ne.s32.totalorder %s2183_s9, 0  ;;  %s2126_s10 = int_to_ptr.vmem [resolvable:$true] %s1049_s10 }
  0x6f   : > { %1261 = vmatprep.subr.bf16.mxu1 %v1250_v7  ;;  %v1879_v19 = vld [vmem:[%s1803_s12 + $0x38] sm:$0xff]  ;;  %v1882_v20 = vld [vmem:[%s1803_s12 + $0x40] sm:$0xff]  ;;  %v1889_v21 = vld [vmem:[%s1803_s12 + $0x48] sm:$0xff]  ;;  %s1036_s12 = scalar_lea.sflag [#allocation4], %s1799_s30  ;;  %s1502_s27 = scalar_lea.vmem %s2126_s10, 128 }
  0x70   : > { %v1896_v22 = vld [vmem:[%s2170_s2] ss:$0 sm:$0xff]  ;;  %p1503_p11 = scmp.ne.s32.totalorder %s2126_s10, %s1502_s27  ;;  %s1582_s25 = smov [#allocation8]  }
  0x71   : > { %1253 = vmatpush3.bf16.msra.mxu0 %v1250_v7  ;;  %s1506_s29 = sshll.u32 %s1582_s25, 4  ;;  %s1507_s29 = int_to_ptr.vmem [resolvable:$false] %s1506_s29 }
  0x72   : > { %1263 = vmatpush3.bf16.msra.mxu1 %v1250_v7  ;;  %p1504_p2 = pnand %p1503_p11, %p2188_p0  ;;  %s1508_s19 = scalar_lea.vmem %s1507_s29, 256 }
  0x73   : > { %p1509_p7 = scmp.lt.s32.totalorder %s2126_s10, %s1507_s29  ;;  %p1510_p9 = scmp.lt.s32.totalorder %s1508_s19, %s1502_s27 }
  0x74   : > { %1212 = vmatmul.mubr.msk.f32.vlgmr.msra.gmra.mrb[0].mxu0 %vm328_vm0, %v1824_v8  ;;  %p1505_p3 = pneg %p1504_p2 }
  0x75   : > { %1227 = vmatmul.mubr.msk.f32.vlgmr.msra.gmra.mrb[0].mxu1 %vm328_vm0, %v1827_v9  ;;  %1214 = vmatprep.mubr.msk.f32.mxu0 %vm328_vm0, %v1830_v10  ;;  %p1511_p12 = por %p1510_p9, %p1509_p7 }
  0x76   : > { %1229 = vmatprep.mubr.msk.f32.mxu1 %vm328_vm0, %v1833_v11 }
  0x77   : > { %p1512_p1 = pnand %p1511_p12, %p1505_p3 }
  0x78   : > { %1215 = vmatmul.mubr.msk.f32.gmra.mrb[2].mxu0 %vm328_vm0, %v1844_v12 }
  0x79   : > { %1230 = vmatmul.mubr.msk.f32.gmra.mrb[2].mxu1 %vm328_vm0, %v1847_v13  ;;  %1217 = vmatprep.mubr.msk.f32.mxu0 %vm328_vm0, %v1850_v14 }
  0x7a   : > { %1232 = vmatprep.mubr.msk.f32.mxu1 %vm328_vm0, %v1853_v15 }
  0x7c   : > { %1218 = vmatmul.mubr.msk.f32.gmra.mrb[4].mxu0 %vm328_vm0, %v1862_v16 }
  0x7d   : > { %1233 = vmatmul.mubr.msk.f32.gmra.mrb[4].mxu1 %vm328_vm0, %v1867_v17  ;;  %1220 = vmatprep.mubr.msk.f32.mxu0 %vm328_vm0, %v1870_v18 }
  0x80   : > { %1221 = vmatmul.mubr.msk.f32.gmra.mrb[6].mxu0 %vm328_vm0, %v1879_v19 }
  0x81   : > { %1223 = vmatprep.mubr.msk.f32.mxu0 %vm328_vm0, %v1882_v20 }
  0x84   : > { %1224 = vmatmul.mubr.msk.f32.gmra.mrb[8].mxu0 %vm328_vm0, %v1889_v21 }
 0x147   : > { %v1213_v23 = vpop.f32.mrb[0].mxu0 }
 0x148   : > { %v1228_v24 = vpop.f32.mrb[0].mxu1  ;;  %v449_v25 = vadd.f32 %v1213_v23, %v1896_v22  ;;  %v443_v27 = vpop.f32.mrb[1].mxu0 }
 0x149   : > { %v499_v26 = vadd.f32 %v1228_v24, %v1896_v22  ;;  %v493_v28 = vpop.f32.mrb[1].mxu1  ;;  %v444_v29 = vadd.f32 %v1896_v22, %v443_v27  ;;  %v1940_v27 = vld [vmem:[%s2171_s3] ss:$0 sm:$0xff] }
 0x14a   : > { %v1902_v30 = vadd.f32 %v1896_v22, %v493_v28  ;;  %v539_v31 = vmul.f32 0.70710677, %v449_v25  ;;  %v523_v62 = vmul.f32 0.5, %v449_v25 }
 0x14b   : > { %v549_v32 = vmul.f32 0.70710677, %v499_v26  ;;  %v538_v33 = vmul.f32 0.70710677, %v444_v29  ;;  %v1216_v35 = vpop.f32.mrb[2].mxu0  ;;  %v533_v3 = vmul.f32 0.5, %v499_v26 }
 0x14c   : > { %v548_v34 = vmul.f32 0.70710677, %v1902_v30  ;;  %1336 = verf.f32 %v539_v31  ;;  %v1231_v36 = vpop.f32.mrb[2].mxu1  ;;  %v459_v37 = vadd.f32 %v1216_v35, %v1896_v22  ;;  %v453_v39 = vpop.f32.mrb[3].mxu0  ;;  %v522_v4 = vmul.f32 0.5, %v444_v29 }
 0x14d   : > { %1338 = verf.f32 %v549_v32  ;;  %v1907_v38 = vadd.f32 %v1231_v36, %v1896_v22  ;;  %v503_v40 = vpop.f32.mrb[3].mxu1  ;;  %v1910_v41 = vadd.f32 %v1896_v22, %v453_v39 }
 0x14e   : > { %1340 = verf.f32 %v538_v33  ;;  %v1913_v42 = vadd.f32 %v1896_v22, %v503_v40  ;;  %v541_v43 = vmul.f32 0.70710677, %v459_v37 }
 0x14f   : > { %1342 = verf.f32 %v548_v34  ;;  %v1219_v44 = vpop.f32.mrb[4].mxu0  ;;  %v551_v46 = vmul.f32 0.70710677, %v1907_v38  ;;  %v540_v47 = vmul.f32 0.70710677, %v1910_v41 }
 0x150   : > { %v1234_v45 = vpop.f32.mrb[4].mxu1  ;;  %1344 = verf.f32 %v541_v43  ;;  %v550_v48 = vmul.f32 0.70710677, %v1913_v42  ;;  %v1919_v49 = vadd.f32 %v1219_v44, %v1896_v22  ;;  %v463_v50 = vpop.f32.mrb[5].mxu0  ;;  %v525_v44 = vmul.f32 0.5, %v459_v37 }
 0x151   : > { %v513_v51 = vpop.f32.mrb[5].mxu1  ;;  %1346 = verf.f32 %v551_v46  ;;  %v1922_v52 = vadd.f32 %v1896_v22, %v463_v50  ;;  %v1946_v26 = vadd.f32 %v1234_v45, %v1896_v22  ;;  %v532_v50 = vmul.f32 0.5, %v1902_v30 }
 0x152   : > { %1348 = verf.f32 %v540_v47  ;;  %v543_v53 = vmul.f32 0.70710677, %v1919_v49  ;;  %v1949_v29 = vadd.f32 %v1896_v22, %v513_v51 }
 0x153   : > { %v1222_v54 = vpop.f32.mrb[6].mxu0  ;;  %1350 = verf.f32 %v550_v48  ;;  %v542_v55 = vmul.f32 0.70710677, %v1922_v52 }
 0x154   : > { %v1927_v56 = vadd.f32 %v1222_v54, %v1896_v22  ;;  %v473_v57 = vpop.f32.mrb[7].mxu0  ;;  %v553_v54 = vmul.f32 0.70710677, %v1946_v26 }
 0x155   : > { %v1930_v58 = vadd.f32 %v1896_v22, %v473_v57  ;;  %1352 = verf.f32 %v542_v55  ;;  %v552_v55 = vmul.f32 0.70710677, %v1949_v29 }
 0x156   : > { %v1337_v59 = vpop.eup %1336  ;;  %v545_v60 = vmul.f32 0.70710677, %v1927_v56  ;;  %1354 = verf.f32 %v543_v53 }
 0x157   : > { %v1339_v61 = vpop.eup %1338  ;;  %v544_v63 = vmul.f32 0.70710677, %v1930_v58  ;;  %v1225_v0 = vpop.f32.mrb[8].mxu0  ;;  %v571_v1 = vadd.f32 1.0, %v1337_v59 }
 0x158   : > { %v1341_v2 = vpop.eup %1340  ;;  %v1935_v7 = vadd.f32 %v1225_v0, %v1896_v22  ;;  %v483_v23 = vpop.f32.mrb[9].mxu0  ;;  %v581_v24 = vadd.f32 1.0, %v1339_v61  ;;  %1356 = verf.f32 %v545_v60  ;;  %v534_v0 = vmul.f32 0.5, %v1913_v42 }
 0x159   : > { %v1343_v28 = vpop.eup %1342  ;;  %v1943_v25 = vadd.f32 %v1896_v22, %v483_v23  ;;  %v587_v31 = vmul.f32 %v571_v1, %v523_v62  ;;  %v570_v32 = vadd.f32 1.0, %v1341_v2  ;;  %1358 = verf.f32 %v544_v63 }
 0x15a   : > { %v597_v33 = vmul.f32 %v581_v24, %v533_v3  ;;  %v1345_v34 = vpop.eup %1344  ;;  %v547_v35 = vmul.f32 0.70710677, %v1935_v7  ;;  %v580_v48 = vadd.f32 1.0, %v1343_v28  ;;  %v535_v22 = vmul.f32 0.5, %v1907_v38 }
 0x15b   : > { %v546_v36 = vmul.f32 0.70710677, %v1943_v25  ;;  %v610_v39 = vmul.f32 %v1940_v27, %v587_v31  ;;  %v586_v40 = vmul.f32 %v570_v32, %v522_v4  ;;  %v1347_v43 = vpop.eup %1346  ;;  %v573_v47 = vadd.f32 1.0, %v1345_v34 }
 0x15c   : > { %v620_v46 = vmul.f32 %v1940_v27, %v597_v33  ;;  %v1349_v45 = vpop.eup %1348  ;;  %v583_v51 = vadd.f32 1.0, %v1347_v43  ;;  %v596_v59 = vmul.f32 %v580_v48, %v532_v50  ;;  %v524_v1 = vmul.f32 0.5, %v1910_v41 }
 0x15d   : > { %627 = vadd.xlane.f32.xlu0 %v610_v39  ;;  %v1351_v53 = vpop.eup %1350  ;;  %1360 = verf.f32 %v546_v36  ;;  %v589_v57 = vmul.f32 %v573_v47, %v525_v44  ;;  %v609_v37 = vmul.f32 %v1940_v27, %v586_v40  ;;  %v572_v38 = vadd.f32 1.0, %v1349_v45 }
 0x15e   : > { %647 = vadd.xlane.f32.xlu1 %v620_v46  ;;  %1362 = verf.f32 %v547_v35  ;;  %v582_v60 = vadd.f32 1.0, %v1351_v53  ;;  %v599_v62 = vmul.f32 %v583_v51, %v535_v22  ;;  %v619_v3 = vmul.f32 %v1940_v27, %v596_v59 }
 0x15f   : > { %v1353_v61 = vpop.eup %1352  ;;  %v612_v30 = vmul.f32 %v1940_v27, %v589_v57  ;;  %1364 = verf.f32 %v552_v55  ;;  %v588_v31 = vmul.f32 %v572_v38, %v524_v1  ;;  %v526_v33 = vmul.f32 0.5, %v1922_v52  ;;  %v931_v1 = vld [vmem:[#allocation7 + $0x10] sm:$0xff] }
 0x160   : > { %v1355_v63 = vpop.eup %1354  ;;  %1366 = verf.f32 %v553_v54  ;;  %v598_v4 = vmul.f32 %v582_v60, %v534_v0  ;;  %v574_v23 = vadd.f32 1.0, %v1353_v61  ;;  %v622_v28 = vmul.f32 %v1940_v27, %v599_v62  ;;  %v930_v0 = vld [vmem:[#allocation7 + $0x8] sm:$0xff] }
 0x161   : > { %625 = vadd.xlane.f32.xlu0 %v609_v37  ;;  %v575_v32 = vadd.f32 1.0, %v1355_v63  ;;  %v527_v42 = vmul.f32 0.5, %v1919_v49  ;;  %v611_v39 = vmul.f32 %v1940_v27, %v588_v31  ;;  %v528_v46 = vmul.f32 0.5, %v1930_v58 }
 0x162   : > { %631 = vadd.xlane.f32.xlu1 %v612_v30  ;;  %v1357_v2 = vpop.eup %1356  ;;  %v621_v41 = vmul.f32 %v1940_v27, %v598_v4  ;;  %v590_v34 = vmul.f32 %v574_v23, %v526_v33  ;;  %v529_v47 = vmul.f32 0.5, %v1927_v56  ;;  %v530_v54 = vmul.f32 0.5, %v1943_v25  ;;  %v932_v4 = vld [vmem:[#allocation7 + $0x18] sm:$0xff] }
 0x163   : > { %v1359_v24 = vpop.eup %1358  ;;  %v591_v40 = vmul.f32 %v575_v32, %v527_v42  ;;  %v577_v43 = vadd.f32 1.0, %v1357_v2  ;;  %v531_v55 = vmul.f32 0.5, %v1935_v7  ;;  %v536_v58 = vmul.f32 0.5, %v1949_v29 }
 0x164   : > { %v576_v35 = vadd.f32 1.0, %v1359_v24  ;;  %v613_v52 = vmul.f32 %v1940_v27, %v590_v34  ;;  %v537_v59 = vmul.f32 0.5, %v1946_v26  ;;  %v929_v26 = vld [vmem:[#allocation7] sm:$0xff]  ;;  %v1579_v2 = vmov 0.0|0.0  }
 0x165   : > { %645 = vadd.xlane.f32.xlu0 %v619_v3  ;;  %v614_v50 = vmul.f32 %v1940_v27, %v591_v40  ;;  %v593_v22 = vmul.f32 %v577_v43, %v529_v47  ;;  %1254 = vmatprep.subr.bf16.mxu1 %v1579_v2  ;;  %v1255_v3 = vpack.c.bf16 %v930_v0, %v929_v26  ;;  %v1581_v23 = vmov 0.0  }
 0x166   : > { %651 = vadd.xlane.f32.xlu1 %v622_v28  ;;  %v592_v49 = vmul.f32 %v576_v35, %v528_v46  ;;  %1243 = vmatprep.mubr.msk.f32.mxu1 %vm1580_vm1, %v1581_v23  ;;  %v1258_v24 = vpack.c.bf16 %v932_v4, %v931_v1 }
 0x167   : > { %v1361_v36 = vpop.eup %1360  ;;  %v616_v60 = vmul.f32 %v1940_v27, %v593_v22  ;;  %1256 = vmatpush3.bf16.msra.mxu1 %v1255_v3 }
 0x168   : > { %v1363_v44 = vpop.eup %1362  ;;  %v578_v48 = vadd.f32 1.0, %v1361_v36  ;;  %v615_v56 = vmul.f32 %v1940_v27, %v592_v49  ;;  %1257 = vmatprep.subr.bf16.mxu1 %v1579_v2 }
 0x169   : > { %649 = vadd.xlane.f32.xlu0 %v621_v41  ;;  %v1365_v45 = vpop.eup %1364  ;;  %v579_v51 = vadd.f32 1.0, %v1363_v44 }
 0x16a   : > { %629 = vadd.xlane.f32.xlu1 %v611_v39  ;;  %v1367_v53 = vpop.eup %1366  ;;  %v594_v57 = vmul.f32 %v578_v48, %v530_v54  ;;  %v584_v37 = vadd.f32 1.0, %v1365_v45 }
 0x16b   : > { %v595_v61 = vmul.f32 %v579_v51, %v531_v55  ;;  %v585_v30 = vadd.f32 1.0, %v1367_v53  ;;  %1259 = vmatpush3.bf16.msra.mxu1 %v1258_v24 }
 0x16c   : > { %v617_v25 = vmul.f32 %v1940_v27, %v594_v57  ;;  %v600_v62 = vmul.f32 %v584_v37, %v536_v58 }
 0x16d   : > { %633 = vadd.xlane.f32.xlu0 %v613_v52  ;;  %v618_v7 = vmul.f32 %v1940_v27, %v595_v61  ;;  %v601_v38 = vmul.f32 %v585_v30, %v537_v59 }
 0x16e   : > { %635 = vadd.xlane.f32.xlu1 %v614_v50  ;;  %v623_v29 = vmul.f32 %v1940_v27, %v600_v62 }
 0x16f   : > { %v624_v63 = vmul.f32 %v1940_v27, %v601_v38 }
 0x171   : > { %637 = vadd.xlane.f32.xlu0 %v615_v56 }
 0x172   : > { %639 = vadd.xlane.f32.xlu1 %v616_v60 }
 0x175   : > { %641 = vadd.xlane.f32.xlu0 %v617_v25 }
 0x176   : > { %643 = vadd.xlane.f32.xlu1 %v618_v7 }
 0x179   : > { %653 = vadd.xlane.f32.xlu0 %v623_v29 }
 0x17a   : > { %655 = vadd.xlane.f32.xlu1 %v624_v63 }
 0x1ea   : > { %v628_v28 = vpop.xlane.xlu0 %627 }
 0x1eb   : > { %v648_v31 = vpop.xlane.xlu1 %647 }
 0x1ee   : > { %v626_v32 = vpop.xlane.xlu0 %625 }
 0x1ef   : > { %v1983_v27 = vpop.xlane.xlu1 %631  ;;  %v657_v33 = vmax.f32 %v626_v32, %v628_v28 }
 0x1f1   : > { %v658_v42 = vrot.slane %v657_v33, 4 }
 0x1f2   : > { %v646_v41 = vpop.xlane.xlu0 %645 }
 0x1f3   : > { %v659_v34 = vmax.f32 %v657_v33, %v658_v42  ;;  %v652_v35 = vpop.xlane.xlu1 %651  ;;  %v692_v36 = vmax.f32 %v646_v41, %v648_v31 }
 0x1f5   : > { %v660_v39 = vrot.slane %v659_v34, 2  ;;  %v693_v40 = vrot.slane %v692_v36, 4 }
 0x1f6   : > { %v650_v43 = vpop.xlane.xlu0 %649 }
 0x1f7   : > { %v661_v44 = vmax.f32 %v659_v34, %v660_v39  ;;  %v694_v46 = vmax.f32 %v692_v36, %v693_v40  ;;  %v630_v47 = vpop.xlane.xlu1 %629  ;;  %v699_v52 = vmax.f32 %v650_v43, %v652_v35 }
 0x1f8   : > { %v664_v49 = vmax.f32 %v630_v47, %v1983_v27 }
 0x1f9   : > { %v662_v48 = vrot.slane %v661_v44, 1  ;;  %v695_v45 = vrot.slane %v694_v46, 2  ;;  %v700_v50 = vrot.slane %v699_v52, 4 }
 0x1fa   : > { %v665_v22 = vrot.slane %v664_v49, 4  ;;  %v1986_v51 = vpop.xlane.xlu0 %633 }
 0x1fb   : > { %v663_v53 = vmax.f32 %v661_v44, %v662_v48  ;;  %v696_v54 = vmax.f32 %v694_v46, %v695_v45  ;;  %v701_v55 = vmax.f32 %v699_v52, %v700_v50  ;;  %v1988_v58 = vpop.xlane.xlu1 %635 }
 0x1fc   : > { %v666_v56 = vmax.f32 %v664_v49, %v665_v22  ;;  %v671_v57 = vmax.f32 %v1986_v51, %v1988_v58 }
 0x1fd   : > { %v713_v37 = vsub.f32 %v626_v32, %v663_v53  ;;  %v714_v59 = vsub.f32 %v628_v28, %v663_v53  ;;  %v697_v60 = vrot.slane %v696_v54, 1  ;;  %v702_v61 = vrot.slane %v701_v55, 2 }
 0x1fe   : > { %v667_v30 = vrot.slane %v666_v56, 2  ;;  %v672_v25 = vrot.slane %v671_v57, 4  ;;  %v1992_v62 = vpop.xlane.xlu0 %637 }
 0x1ff   : > { %v729_v7 = vmul.f32 1.442695, %v713_v37  ;;  %v731_v38 = vmul.f32 1.442695, %v714_v59  ;;  %v698_v29 = vmax.f32 %v696_v54, %v697_v60  ;;  %v703_v63 = vmax.f32 %v701_v55, %v702_v61  ;;  %v1994_v26 = vpop.xlane.xlu1 %639 }
 0x200   : > { %v668_v0 = vmax.f32 %v666_v56, %v667_v30  ;;  %v673_v1 = vmax.f32 %v671_v57, %v672_v25  ;;  %v678_v2 = vmax.f32 %v1992_v62, %v1994_v26 }
 0x201   : > { %1368 = vpow2.f32 %v729_v7  ;;  %v723_v3 = vsub.f32 %v646_v41, %v698_v29  ;;  %v724_v4 = vsub.f32 %v648_v31, %v698_v29  ;;  %v704_v23 = vrot.slane %v703_v63, 1 }
 0x202   : > { %1370 = vpow2.f32 %v731_v38  ;;  %v669_v24 = vrot.slane %v668_v0, 1  ;;  %v674_v28 = vrot.slane %v673_v1, 2  ;;  %v679_v32 = vrot.slane %v678_v2, 4  ;;  %v1998_v33 = vpop.xlane.xlu0 %641 }
 0x203   : > { %v749_v42 = vmul.f32 1.442695, %v723_v3  ;;  %v751_v34 = vmul.f32 1.442695, %v724_v4  ;;  %v705_v36 = vmax.f32 %v703_v63, %v704_v23  ;;  %v2000_v39 = vpop.xlane.xlu1 %643 }
 0x204   : > { %v670_v40 = vmax.f32 %v668_v0, %v669_v24  ;;  %v675_v44 = vmax.f32 %v673_v1, %v674_v28  ;;  %v680_v46 = vmax.f32 %v678_v2, %v679_v32  ;;  %v685_v52 = vmax.f32 %v1998_v33, %v2000_v39 }
 0x205   : > { %1372 = vpow2.f32 %v749_v42  ;;  %v725_v31 = vsub.f32 %v650_v43, %v705_v36  ;;  %v726_v41 = vsub.f32 %v652_v35, %v705_v36 }
 0x206   : > { %1374 = vpow2.f32 %v751_v34  ;;  %v715_v49 = vsub.f32 %v630_v47, %v670_v40  ;;  %v716_v48 = vsub.f32 %v1983_v27, %v670_v40  ;;  %v676_v45 = vrot.slane %v675_v44, 1  ;;  %v2005_v50 = vpop.xlane.xlu0 %653 }
 0x207   : > { %v753_v22 = vmul.f32 1.442695, %v725_v31  ;;  %v755_v53 = vmul.f32 1.442695, %v726_v41  ;;  %v681_v54 = vrot.slane %v680_v46, 2  ;;  %v686_v55 = vrot.slane %v685_v52, 4  ;;  %v2007_v56 = vpop.xlane.xlu1 %655 }
 0x208   : > { %v733_v57 = vmul.f32 1.442695, %v715_v49  ;;  %v735_v37 = vmul.f32 1.442695, %v716_v48  ;;  %v677_v59 = vmax.f32 %v675_v44, %v676_v45  ;;  %v706_v43 = vmax.f32 %v2005_v50, %v2007_v56 }
 0x209   : > { %1376 = vpow2.f32 %v753_v22  ;;  %v682_v35 = vmax.f32 %v680_v46, %v681_v54  ;;  %v687_v47 = vmax.f32 %v685_v52, %v686_v55 }
 0x20a   : > { %1378 = vpow2.f32 %v733_v57  ;;  %v717_v27 = vsub.f32 %v1986_v51, %v677_v59  ;;  %v718_v60 = vsub.f32 %v1988_v58, %v677_v59  ;;  %v707_v61 = vrot.slane %v706_v43, 4 }
 0x20b   : > { %v2013_v30 = vpop.eup %1368  ;;  %1380 = vpow2.f32 %v735_v37  ;;  %v683_v25 = vrot.slane %v682_v35, 1  ;;  %v688_v7 = vrot.slane %v687_v47, 2 }
 0x20c   : > { %v2015_v38 = vpop.eup %1370  ;;  %1382 = vpow2.f32 %v755_v53  ;;  %v737_v29 = vmul.f32 1.442695, %v717_v27  ;;  %v739_v63 = vmul.f32 1.442695, %v718_v60  ;;  %v708_v0 = vmax.f32 %v706_v43, %v707_v61 }
 0x20d   : > { %v761_v1 = vadd.f32 %v2015_v38, %v2013_v30  ;;  %v684_v2 = vmax.f32 %v682_v35, %v683_v25  ;;  %v689_v3 = vmax.f32 %v687_v47, %v688_v7 }
 0x20e   : > { %1384 = vpow2.f32 %v737_v29  ;;  %v709_v51 = vrot.slane %v708_v0, 2 }
 0x20f   : > { %v2019_v58 = vpop.eup %1372  ;;  %v762_v4 = vrot.slane %v761_v1, 4  ;;  %1386 = vpow2.f32 %v739_v63  ;;  %v719_v23 = vsub.f32 %v1992_v62, %v684_v2  ;;  %v720_v24 = vsub.f32 %v1994_v26, %v684_v2 }
 0x210   : > { %v2023_v28 = vpop.eup %1374  ;;  %v690_v32 = vrot.slane %v689_v3, 1  ;;  %v710_v42 = vmax.f32 %v708_v0, %v709_v51 }
 0x211   : > { %v763_v34 = vadd.f32 %v762_v4, %v761_v1  ;;  %v796_v36 = vadd.f32 %v2023_v28, %v2019_v58  ;;  %v741_v40 = vmul.f32 1.442695, %v719_v23  ;;  %v743_v44 = vmul.f32 1.442695, %v720_v24 }
 0x212   : > { %v691_v46 = vmax.f32 %v689_v3, %v690_v32  ;;  %v711_v52 = vrot.slane %v710_v42, 1 }
 0x213   : > { %v2027_v31 = vpop.eup %1376  ;;  %v764_v41 = vrot.slane %v763_v34, 2  ;;  %v797_v49 = vrot.slane %v796_v36, 4  ;;  %1388 = vpow2.f32 %v741_v40 }
 0x214   : > { %v2029_v62 = vpop.eup %1378  ;;  %1390 = vpow2.f32 %v743_v44  ;;  %v721_v26 = vsub.f32 %v1998_v33, %v691_v46  ;;  %v722_v48 = vsub.f32 %v2000_v39, %v691_v46  ;;  %v712_v45 = vmax.f32 %v710_v42, %v711_v52 }
 0x215   : > { %v2033_v22 = vpop.eup %1380  ;;  %v765_v53 = vadd.f32 %v764_v41, %v763_v34  ;;  %v798_v54 = vadd.f32 %v797_v49, %v796_v36 }
 0x216   : > { %v2035_v55 = vpop.eup %1382  ;;  %v768_v57 = vadd.f32 %v2033_v22, %v2029_v62  ;;  %v745_v37 = vmul.f32 1.442695, %v721_v26  ;;  %v747_v59 = vmul.f32 1.442695, %v722_v48  ;;  %v727_v43 = vsub.f32 %v2005_v50, %v712_v45 }
 0x217   : > { %v766_v35 = vrot.slane %v765_v53, 1  ;;  %v799_v47 = vrot.slane %v798_v54, 2  ;;  %v803_v33 = vadd.f32 %v2035_v55, %v2027_v31  ;;  %v728_v39 = vsub.f32 %v2007_v56, %v712_v45 }
 0x218   : > { %v2043_v27 = vpop.eup %1384  ;;  %v769_v60 = vrot.slane %v768_v57, 4  ;;  %1392 = vpow2.f32 %v745_v37  ;;  %v757_v61 = vmul.f32 1.442695, %v727_v43 }
 0x219   : > { %v2045_v25 = vpop.eup %1386  ;;  %v767_v7 = vadd.f32 %v766_v35, %v765_v53  ;;  %v800_v29 = vadd.f32 %v799_v47, %v798_v54  ;;  %v804_v63 = vrot.slane %v803_v33, 4  ;;  %1394 = vpow2.f32 %v747_v59 }
 0x21a   : > { %v770_v0 = vadd.f32 %v769_v60, %v768_v57  ;;  %v775_v50 = vadd.f32 %v2045_v25, %v2043_v27  ;;  %1396 = vpow2.f32 %v757_v61  ;;  %v759_v1 = vmul.f32 1.442695, %v728_v39 }
 0x21b   : > { %1398 = vrcp.f32 %v767_v7  ;;  %v801_v2 = vrot.slane %v800_v29, 1  ;;  %v805_v56 = vadd.f32 %v804_v63, %v803_v33 }
 0x21c   : > { %v771_v3 = vrot.slane %v770_v0, 2  ;;  %v776_v51 = vrot.slane %v775_v50, 4  ;;  %1400 = vpow2.f32 %v759_v1 }
 0x21d   : > { %v2049_v4 = vpop.eup %1388  ;;  %v802_v23 = vadd.f32 %v801_v2, %v800_v29  ;;  %v806_v24 = vrot.slane %v805_v56, 2 }
 0x21e   : > { %v2051_v32 = vpop.eup %1390  ;;  %v772_v42 = vadd.f32 %v771_v3, %v770_v0  ;;  %v777_v34 = vadd.f32 %v776_v51, %v775_v50 }
 0x21f   : > { %v807_v36 = vadd.f32 %v806_v24, %v805_v56  ;;  %v782_v40 = vadd.f32 %v2051_v32, %v2049_v4  ;;  %1402 = vrcp.f32 %v802_v23 }
 0x220   : > { %v773_v44 = vrot.slane %v772_v42, 1  ;;  %v778_v46 = vrot.slane %v777_v34, 2 }
 0x221   : > { %v808_v52 = vrot.slane %v807_v36, 1  ;;  %v783_v41 = vrot.slane %v782_v40, 4 }
 0x222   : > { %v2055_v49 = vpop.eup %1392  ;;  %v774_v26 = vadd.f32 %v773_v44, %v772_v42  ;;  %v779_v48 = vadd.f32 %v778_v46, %v777_v34 }
 0x223   : > { %v2057_v45 = vpop.eup %1394  ;;  %v809_v53 = vadd.f32 %v808_v52, %v807_v36  ;;  %v784_v54 = vadd.f32 %v783_v41, %v782_v40 }
 0x224   : > { %v2059_v57 = vpop.eup %1396  ;;  %1404 = vrcp.f32 %v774_v26  ;;  %v780_v37 = vrot.slane %v779_v48, 1  ;;  %v789_v59 = vadd.f32 %v2057_v45, %v2055_v49 }
 0x225   : > { %v1399_v43 = vpop.eup %1398  ;;  %1406 = vrcp.f32 %v809_v53  ;;  %v785_v35 = vrot.slane %v784_v54, 2 }
 0x226   : > { %v2063_v47 = vpop.eup %1400  ;;  %v781_v33 = vadd.f32 %v780_v37, %v779_v48  ;;  %v790_v39 = vrot.slane %v789_v59, 4  ;;  %v825_v7 = vmul.f32 %v1399_v43, %v2013_v30  ;;  %v826_v63 = vmul.f32 %v1399_v43, %v2015_v38 }
 0x227   : > { %v786_v60 = vadd.f32 %v785_v35, %v784_v54  ;;  %v810_v61 = vadd.f32 %v2063_v47, %v2059_v57 }
 0x228   : > { %1408 = vrcp.f32 %v781_v33  ;;  %v791_v29 = vadd.f32 %v790_v39, %v789_v59  ;;  %v841_v51 = vmul.f32 %v825_v7, %v1814_v5  ;;  %v842_v23 = vmul.f32 %v826_v63, %v1824_v8 }
 0x229   : > { %v787_v0 = vrot.slane %v786_v60, 1  ;;  %v811_v50 = vrot.slane %v810_v61, 4  ;;  %v1403_v1 = vpop.eup %1402 }
 0x22a   : > { %v792_v56 = vrot.slane %v791_v29, 2  ;;  %v835_v30 = vmul.f32 %v1403_v1, %v2019_v58  ;;  %v836_v36 = vmul.f32 %v1403_v1, %v2023_v28  ;;  %v857_v8 = vsel %vm328_vm0, %v841_v51, 0.0 }
 0x22b   : > { %v788_v2 = vadd.f32 %v787_v0, %v786_v60  ;;  %v812_v3 = vadd.f32 %v811_v50, %v810_v61  ;;  %v858_v26 = vsel %vm328_vm0, %v842_v23, 0.0 }
 0x22c   : > { %v793_v24 = vadd.f32 %v792_v56, %v791_v29  ;;  %v851_v53 = vmul.f32 %v835_v30, %v1817_v6  ;;  %v859_v35 = vadd.f32 %v858_v26, %v857_v8 }
 0x22d   : > { %1410 = vrcp.f32 %v788_v2  ;;  %v813_v42 = vrot.slane %v812_v3, 2 }
 0x22e   : > { %v1405_v34 = vpop.eup %1404  ;;  %v794_v5 = vrot.slane %v793_v24, 1  ;;  %v902_v6 = vsel %vm328_vm0, %v851_v53, 0.0  ;;  %v860_v63 = vrot.slane %v859_v35, 4 }
 0x22f   : > { %v1407_v40 = vpop.eup %1406  ;;  %v827_v38 = vmul.f32 %v1405_v34, %v2029_v62  ;;  %v828_v44 = vmul.f32 %v1405_v34, %v2033_v22  ;;  %v814_v41 = vadd.f32 %v813_v42, %v812_v3  ;;  %v852_v62 = vmul.f32 %v836_v36, %v1827_v9 }
 0x230   : > { %v837_v46 = vmul.f32 %v1407_v40, %v2027_v31  ;;  %v838_v52 = vmul.f32 %v1407_v40, %v2035_v55  ;;  %v795_v22 = vadd.f32 %v794_v5, %v793_v24  ;;  %v861_v24 = vadd.f32 %v860_v63, %v859_v35 }
 0x231   : > { %v843_v48 = vmul.f32 %v827_v38, %v1830_v10  ;;  %v844_v58 = vmul.f32 %v828_v44, %v1844_v12  ;;  %v815_v54 = vrot.slane %v814_v41, 1  ;;  %v903_v60 = vsel %vm328_vm0, %v852_v62, 0.0 }
 0x232   : > { %v1409_v28 = vpop.eup %1408  ;;  %v853_v37 = vmul.f32 %v837_v46, %v1833_v11  ;;  %v854_v59 = vmul.f32 %v838_v52, %v1847_v13  ;;  %1412 = vrcp.f32 %v795_v22  ;;  %v904_v0 = vadd.f32 %v903_v60, %v902_v6 }
 0x233   : > { %v866_v31 = vsel %vm328_vm0, %v843_v48, 0.0  ;;  %v867_v55 = vsel %vm328_vm0, %v844_v58, 0.0  ;;  %v829_v10 = vmul.f32 %v1409_v28, %v2043_v27  ;;  %v830_v12 = vmul.f32 %v1409_v28, %v2045_v25 }
 0x234   : > { %v868_v43 = vadd.f32 %v867_v55, %v866_v31  ;;  %v816_v33 = vadd.f32 %v815_v54, %v814_v41  ;;  %v911_v61 = vsel %vm328_vm0, %v853_v37, 0.0  ;;  %v912_v11 = vsel %vm328_vm0, %v854_v59, 0.0 }
 0x235   : > { %v845_v9 = vmul.f32 %v829_v10, %v1850_v14  ;;  %v846_v13 = vmul.f32 %v830_v12, %v1862_v16  ;;  %v913_v56 = vadd.f32 %v912_v11, %v911_v61  ;;  %v862_v46 = vrot.slane %v861_v24, 2 }
 0x236   : > { %v869_v7 = vrot.slane %v868_v43, 4  ;;  %1414 = vrcp.f32 %v816_v33 }
 0x237   : > { %v1411_v39 = vpop.eup %1410  ;;  %v875_v27 = vsel %vm328_vm0, %v845_v9, 0.0  ;;  %v876_v14 = vsel %vm328_vm0, %v846_v13, 0.0  ;;  %v914_v30 = vrot.slane %v913_v56, 4  ;;  %v863_v54 = vadd.f32 %v862_v46, %v861_v24 }
 0x238   : > { %v831_v25 = vmul.f32 %v1411_v39, %v2049_v4  ;;  %v832_v29 = vmul.f32 %v1411_v39, %v2051_v32  ;;  %v877_v50 = vadd.f32 %v876_v14, %v875_v27  ;;  %v870_v3 = vadd.f32 %v869_v7, %v868_v43 }
 0x239   : > { %v905_v32 = vrot.slane %v904_v0, 4  ;;  %v915_v48 = vadd.f32 %v914_v30, %v913_v56  ;;  %v864_v6 = vrot.slane %v863_v54, 1 }
 0x23a   : > { %v847_v1 = vmul.f32 %v831_v25, %v1870_v18  ;;  %v848_v2 = vmul.f32 %v832_v29, %v1879_v19  ;;  %v878_v16 = vrot.slane %v877_v50, 4  ;;  %v871_v40 = vrot.slane %v870_v3, 2 }
 0x23b   : > { %v906_v52 = vadd.f32 %v905_v32, %v904_v0  ;;  %v916_v59 = vrot.slane %v915_v48, 2 }
 0x23c   : > { %v884_v51 = vsel %vm328_vm0, %v847_v1, 0.0  ;;  %v885_v23 = vsel %vm328_vm0, %v848_v2, 0.0  ;;  %v879_v42 = vadd.f32 %v878_v16, %v877_v50  ;;  %v1413_v34 = vpop.eup %1412  ;;  %v872_v58 = vadd.f32 %v871_v40, %v870_v3 }
 0x23d   : > { %v886_v4 = vadd.f32 %v885_v23, %v884_v51  ;;  %v833_v38 = vmul.f32 %v1413_v34, %v2055_v49  ;;  %v834_v18 = vmul.f32 %v1413_v34, %v2057_v45  ;;  %v907_v55 = vrot.slane %v906_v52, 2  ;;  %v1170_v34 = vld [vmem:[%s2173_s5] ss:$0 sm:$0xff] }
 0x23e   : > { %v880_v19 = vrot.slane %v879_v42, 2  ;;  %v873_v43 = vrot.slane %v872_v58, 1  ;;  %v917_v60 = vadd.f32 %v916_v59, %v915_v48 }
 0x23f   : > { %v887_v36 = vrot.slane %v886_v4, 4  ;;  %v849_v5 = vmul.f32 %v833_v38, %v1882_v20  ;;  %v850_v41 = vmul.f32 %v834_v18, %v1889_v21 }
 0x240   : > { %v1415_v8 = vpop.eup %1414  ;;  %v881_v62 = vadd.f32 %v880_v19, %v879_v42  ;;  %v874_v61 = vadd.f32 %v873_v43, %v872_v58  ;;  %v918_v63 = vrot.slane %v917_v60, 1 }
 0x241   : > { %v888_v44 = vadd.f32 %v887_v36, %v886_v4  ;;  %v893_v28 = vsel %vm328_vm0, %v849_v5, 0.0  ;;  %v894_v53 = vsel %vm328_vm0, %v850_v41, 0.0  ;;  %v839_v49 = vmul.f32 %v1415_v8, %v2059_v57 }
 0x242   : > { %v895_v45 = vadd.f32 %v894_v53, %v893_v28  ;;  %v840_v22 = vmul.f32 %v1415_v8, %v2063_v47  ;;  %v882_v35 = vrot.slane %v881_v62, 1  ;;  %v908_v47 = vadd.f32 %v907_v55, %v906_v52 }
 0x243   : > { %v889_v26 = vrot.slane %v888_v44, 2  ;;  %v855_v20 = vmul.f32 %v839_v49, %v1853_v15  ;;  %v919_v16 = vadd.f32 %v918_v63, %v917_v60 }
 0x244   : > { %v896_v21 = vrot.slane %v895_v45, 4  ;;  %v856_v37 = vmul.f32 %v840_v22, %v1867_v17  ;;  %v883_v11 = vadd.f32 %v882_v35, %v881_v62  ;;  %v865_v17 = vadd.f32 %v864_v6, %v863_v54 }
 0x245   : > { %v890_v31 = vadd.f32 %v889_v26, %v888_v44  ;;  %v920_v10 = vsel %vm328_vm0, %v855_v20, 0.0  ;;  %v909_v27 = vrot.slane %v908_v47, 1 }
 0x246   : > { %v897_v12 = vadd.f32 %v896_v21, %v895_v45  ;;  %v921_v57 = vsel %vm328_vm0, %v856_v37, 0.0  ;;  %v949_v0 = vsel %vm948_vm2, %v874_v61, %v865_v17 }
 0x247   : > { %v922_v9 = vadd.f32 %v921_v57, %v920_v10  ;;  %v891_v33 = vrot.slane %v890_v31, 1  ;;  %v951_v1 = vsel %vm950_vm3, %v883_v11, %v949_v0  ;;  %v910_v2 = vadd.f32 %v909_v27, %v908_v47 }
 0x248   : > { %v898_v39 = vrot.slane %v897_v12, 2 }
 0x249   : > { %v923_v15 = vrot.slane %v922_v9, 4  ;;  %v892_v7 = vadd.f32 %v891_v33, %v890_v31 }
 0x24a   : > { %v899_v13 = vadd.f32 %v898_v39, %v897_v12 }
 0x24b   : > { %v924_v25 = vadd.f32 %v923_v15, %v922_v9  ;;  %v953_v3 = vsel %vm952_vm4, %v892_v7, %v951_v1 }
 0x24c   : > { %v900_v29 = vrot.slane %v899_v13, 1 }
 0x24d   : > { %v925_v14 = vrot.slane %v924_v25, 2 }
 0x24e   : > { %v901_v50 = vadd.f32 %v900_v29, %v899_v13 }
 0x24f   : > { %v926_v56 = vadd.f32 %v925_v14, %v924_v25 }
 0x250   : > { %v955_v51 = vsel %vm954_vm5, %v901_v50, %v953_v3 }
 0x251   : > { %v927_v23 = vrot.slane %v926_v56, 1  ;;  %v957_v4 = vsel %vm956_vm6, %v910_v2, %v955_v51 }
 0x252   : > { %v959_v24 = vsel %vm958_vm7, %v919_v16, %v957_v4 }
 0x253   : > { %v928_v32 = vadd.f32 %v927_v23, %v926_v56 }
 0x255   : > { %v961_v42 = vsel %vm960_vm8, %v928_v32, %v959_v24 }
 0x256   : > { %1244 = vmatmul.mubr.msk.f32.vlgmr.msra.gmra.mrb[6].mxu1 %vm328_vm0, %v961_v42 }
 0x329   : > { %v1030_v30 = vpop.f32.mrb[6].mxu1 }
 0x32a   : > { %v1031_v36 = vadd.f32 %v1170_v34, %v1030_v30  ;;  %v1245_v40 = vpop.f32.mrb[7].mxu1 }
 0x32c   : > { %1034 = vst [vmem:[%s299_s13] sm:$0xff] %v1031_v36 }
 0x32d   : > { %1515 = shalt.err (!%p1512_p1)
}
 0x32e   : > { %s1516_s30 = scalar_lea.hbm %s2124_s7, 128  ;;  %s1520_s17 = scalar_lea.hbm %s2174_s6, 256 }
 0x32f   : > { %p1517_p13 = scmp.ne.s32.totalorder %s2124_s7, %s1516_s30  ;;  %p1521_p4 = scmp.lt.u32.totalorder %s2124_s7, %s2174_s6 }
 0x330   : > { %p1522_p5 = scmp.lt.u32.totalorder %s1520_s17, %s1516_s30  ;;  %p1524_p11 = scmp.lt.u32.totalorder %s1516_s30, %s2124_s7 }
 0x331   : > { %p1518_p6 = pnand %p1517_p13, %p2188_p0 }
 0x332   : > { %p1523_p8 = por %p1522_p5, %p1521_p4 }
 0x333   : > { %p1519_p10 = pneg %p1518_p6 }
 0x334   : > { %p1525_p2 = por %p1524_p11, %p1523_p8 }
 0x336   : > { %p1526_p3 = pnand %p1525_p2, %p1519_p10 }
 0x338   : > { %1529 = shalt.err (!%p1526_p3)
}
 0x339   : > { %1274 = dma.vmem_to_hbm [thread:$0]  (%p2188_p0), %s2126_s10, 128, %s2124_s7, %s1036_s12  }
 0x33a PF: > { %s1061_s13 = sand.u32 1, %s1560_s21   ;;  %p2189_p7 = scmp.ne.s32.totalorder %s2179_s28, 0 }
 0x33b   : > { %p2190_p9 = scmp.ge.s32.totalorder %s1572_s24, 2  ;;  %s1062_s15 = scalar_lea.sflag [#allocation4], %s1061_s13 }
 0x33d   : > { %p1288_p12 = pnand %p2190_p9, %p2189_p7 }
 0x33f   : > { %1555 = dma.done.wait (!%p1288_p12), %s1062_s15, 128  }
 0x340   : > { %1557 = vsyncadd (!%p1288_p12), %s1062_s15, 4294967168  ;;  %p20_p1 = scmp.ge.s32.totalorder %s1734_s8, 4   ;;  %s2191_s21 = smov %s1564_s22 }
 0x341   : > { %s2192_s22 = smov %s1568_s23  ;;  %s2193_s23 = smov %s1750_s11 }
 0x342   : > { %s2194_s24 = smov %s1734_s8  ;;  %22 = sbr.rel (!%p20_p1) target bundleno = 6 (0x6), region = 97 }
 0x349   :  { %1067 = vsyncpa [#allocation3], 1 }
 0x34a   :  { %1069 = vsyncpa [#allocation3 + $0x1], 1 }
 0x34b   :  { %1070 = vsyncpa [#allocation6], 1 }
 0x34c   :  { %1071 = vsyncpa [#allocation4], 1 }
 0x34d   :  { %1073 = vsyncpa [#allocation4 + $0x1], 1 }

// kernel: tpu_custom_call.1
= control target key start
LH: loop header
LB: loop body
LE: loop exit
PB: predicated region body
PF: predicated region fallthrough
CT: control target
= control target key end

     0   :  { %11 = vsyncpa [#allocation3], 0  ;;  %s2168_s0 = inlined_call_operand.hbm [shape: f32[16,16,32], index: 0, kind: input, shape index: {}]   ;;  %s2169_s1 = inlined_call_operand.hbm [shape: f32[32,128], index: 1, kind: input, shape index: {}]   ;;  %s2170_s2 = inlined_call_operand.vmem [shape: f32[1,128], index: 2, kind: input, shape index: {}]   ;;  %s2171_s3 = inlined_call_operand.vmem [shape: f32[1,128], index: 3, kind: input, shape index: {}]   ;;  %s2172_s4 = inlined_call_operand.hbm [shape: f32[32,128], index: 4, kind: input, shape index: {}]   ;;  %s2173_s5 = inlined_call_operand.vmem [shape: f32[1,128], index: 5, kind: input, shape index: {}]   ;;  %s2174_s6 = inlined_call_operand.hbm [shape: f32[16,128], index: 6, kind: output, shape index: {}]  }
   0x1   :  { %13 = vsyncpa [#allocation3 + $0x1], 0 }
   0x2   :  { %14 = vsyncpa [#allocation6], 0 }
   0x3   :  { %15 = vsyncpa [#allocation4], 0 }
   0x4   :  { %17 = vsyncpa [#allocation4 + $0x1], 0  ;;  %s1618_s21 = smov 0   ;;  %s1620_s22 = smov 0  }
   0x5   :  { %s1622_s23 = smov 0   ;;  %s1624_s24 = smov 0  }
   0x6 LB: > { %s1639_s25 = sadd.s32 4294967295, %s1572_s24   ;;  %s1138_s26 = sadd.s32 4294967294, %s1572_s24   ;;  %s1572_s24 = sphi %s1624_s24, %s2194_s24   ;;  %s1568_s23 = sphi %s1622_s23, %s2193_s23   ;;  %s1564_s22 = sphi %s1620_s22, %s2192_s22   ;;  %s1560_s21 = sphi %s1618_s21, %s2191_s21  }
   0x7   : > { %p43_p0 = scmp.ne.s32.totalorder %s1564_s22, %s1560_s21  ;;  %p2175_p1 = scmp.eq.s32.totalorder %s1639_s25, 0 }
   0x8   : > { %p178_p3 = scmp.eq.s32.totalorder %s1138_s26, 1  ;;  %p1139_p5 = scmp.ge.s32.totalorder %s1572_s24, 1 }
   0x9   : > { %p1648_p4 = por %p2175_p1, %p43_p0  ;;  %p185_p7 = scmp.lt.s32.totalorder %s1572_s24, 3 }
   0xa   : > { %p1653_p6 = por %p178_p3, %p43_p0  ;;  %s1574_s30 = smov [#allocation5]  }
   0xb   : > { %s2178_s27 = scalar_select %p1648_p4, 1, 0 }
   0xc   : > { %s2179_s28 = scalar_select %p1653_p6, 1, 0 }
   0xd   : > { %p1658_p8 = pnand %p1139_p5, %p185_p7  ;;  %s197_s7 = sshll.u32 %s1574_s30, 4  ;;  %s1662_s7 = int_to_ptr.vmem [resolvable:$true] %s197_s7 }
   0xe   : > { %s1575_s9 = smov [#allocation7]   ;;  %s1416_s13 = scalar_lea.hbm %s2169_s1, 512 }
   0xf   : > { %p1276_p9 = pneg %p1658_p8  ;;  %s216_s10 = sshll.u32 %s1575_s9, 4  ;;  %s1673_s10 = int_to_ptr.vmem [resolvable:$true] %s216_s10 }
  0x10   : > { %p1417_p12 = scmp.ne.s32.totalorder %s2169_s1, %s1416_s13  ;;  %p1423_p5 = scmp.lt.u32.totalorder %s1416_s13, %s2169_s1 }
  0x11   : > { %p1669_p11 = pnand %p1276_p9, %p2175_p1 }
  0x13   : > { %p1418_p13 = pneg %p1669_p11 }
  0x15   : > { %p1419_p0 = pnand %p1418_p13, %p1417_p12 }
  0x17   : > { %p1420_p3 = pneg %p1419_p0 }
  0x19   : > { %p1425_p7 = pnand %p1423_p5, %p1420_p3 }
  0x1b   : > { %1428 = shalt.err (!%p1425_p7)
}
  0x1c   : > { %s1429_s18 = scalar_lea.vmem %s1662_s7, 512  ;;  %p1437_p2 = scmp.lt.s32.totalorder %s1662_s7, %s1662_s7 }
  0x1d   : > { %p1430_p9 = scmp.ne.s32.totalorder %s1662_s7, %s1429_s18  ;;  %p1438_p12 = scmp.lt.s32.totalorder %s1429_s18, %s1429_s18 }
  0x1f   : > { %p1432_p10 = pnand %p1430_p9, %p1418_p13  ;;  %p1439_p0 = por %p1438_p12, %p1437_p2 }
  0x21   : > { %p1433_p1 = pneg %p1432_p10 }
  0x23   : > { %p1440_p6 = pnand %p1439_p0, %p1433_p1 }
  0x25   : > { %1443 = shalt.err (!%p1440_p6)
}
  0x26   : > { %s1576_s19 = smov 128   ;;  %s1577_s20 = smov 8  }
  0x27   : > { %1279 = dma.hbm_to_vmem [thread:$0]  (!%p1669_p11), %s2169_s1, 512, %s1662_s7, [#allocation6], %s1576_s19, %s1576_s19, %s1577_s20  }
  0x28   : > { %s1444_s12 = scalar_lea.hbm %s2172_s4, 512 }
  0x29   : > { %p1445_p1 = scmp.ne.s32.totalorder %s2172_s4, %s1444_s12  ;;  %p1451_p10 = scmp.lt.u32.totalorder %s1444_s12, %s2172_s4 }
  0x2b   : > { %p1447_p2 = pnand %p1445_p1, %p1418_p13 }
  0x2d   : > { %p1448_p6 = pneg %p1447_p2 }
  0x2f   : > { %p1453_p3 = pnand %p1451_p10, %p1448_p6 }
  0x31   : > { %1456 = shalt.err (!%p1453_p3)
}
  0x32   : > { %s1457_s7 = scalar_lea.vmem %s1673_s10, 512  ;;  %p1465_p12 = scmp.lt.s32.totalorder %s1673_s10, %s1673_s10 }
  0x33   : > { %p1458_p5 = scmp.ne.s32.totalorder %s1673_s10, %s1457_s7  ;;  %p1466_p0 = scmp.lt.s32.totalorder %s1457_s7, %s1457_s7 }
  0x35   : > { %p1460_p7 = pnand %p1458_p5, %p1418_p13  ;;  %p1467_p1 = por %p1466_p0, %p1465_p12 }
  0x37   : > { %p1461_p9 = pneg %p1460_p7 }
  0x39   : > { %p1468_p2 = pnand %p1467_p1, %p1461_p9 }
  0x3b   : > { %1471 = shalt.err (!%p1468_p2)
}
  0x3c   : > { %1282 = dma.hbm_to_vmem [thread:$0]  (!%p1669_p11), %s2172_s4, 512, %s1673_s10, [#allocation6], %s1576_s19, %s1576_s19, %s1577_s20  }
  0x3d   : > { %s1734_s8 = sadd.s32 1, %s1572_s24   ;;  %s30_s26 = sadd.s32 1, %s1568_s23 }
  0x3e   : > { %s27_s30 = ssub.s32 %s1572_s24, %s1734_s8  ;;  %p37_p13 = scmp.ne.s32.totalorder %s1568_s23, %s1564_s22 }
  0x3f   : > { %p28_p6 = scmp.eq.s32.totalorder %s27_s30, 0  ;;  %p38_p10 = scmp.eq.s32.totalorder %s1572_s24, 0 }
  0x40   : > { %p2182_p3 = scmp.eq.s32.totalorder %s1639_s25, 1  ;;  %p1293_p7 = scmp.lt.s32.totalorder %s1572_s24, 2 }
  0x41   : > { %s1750_s11 = scalar_select %p28_p6, %s1568_s23, %s30_s26  }
  0x42   : > { %p1744_p5 = por %p2182_p3, %p37_p13  ;;  %p39_p9 = por %p38_p10, %p37_p13 }
  0x43   : > { %s233_s12 = sand.u32 1, %s1568_s23   ;;  %s1177_s10 = sshll.u32 %s1572_s24, 11 }
  0x44   : > { %s2183_s9 = scalar_select %p1744_p5, 1, 0 }
  0x45   : > { %s1143_s13 = sshll.u32 %s233_s12, 7  ;;  %s1757_s16 = scalar_lea.hbm %s2168_s0, %s1177_s10 }
  0x46   : > { %s237_s7 = scalar_lea.vmem [#allocation2], %s1143_s13  ;;  %p1761_p11 = pnand %p1293_p7, %p39_p9 }
  0x47   : > { %s245_s17 = sshll.u32 %s237_s7, 4  ;;  %s1765_s26 = scalar_lea.sflag [#allocation3], %s233_s12  ;;  %s1759_s17 = int_to_ptr.vmem [resolvable:$true] %s245_s17 }
  0x48   : > { %s1472_s30 = scalar_lea.hbm %s1757_s16, 2048  ;;  %p1474_p0 = pneg %p1761_p11 }
  0x49   : > { %p1473_p12 = scmp.ne.s32.totalorder %s1757_s16, %s1472_s30  ;;  %s1477_s14 = scalar_lea.hbm %s2168_s0, 4096 }
  0x4a   : > { %p1478_p13 = scmp.lt.u32.totalorder %s1757_s16, %s2168_s0  ;;  %p1479_p6 = scmp.lt.u32.totalorder %s1477_s14, %s1472_s30 }
  0x4b   : > { %p1475_p1 = pnand %p1474_p0, %p1473_p12  ;;  %p1481_p3 = scmp.lt.u32.totalorder %s1472_s30, %s1757_s16 }
  0x4c   : > { %p1480_p10 = por %p1479_p6, %p1478_p13 }
  0x4d   : > { %p1476_p2 = pneg %p1475_p1 }
  0x4e   : > { %p1482_p7 = por %p1481_p3, %p1480_p10 }
  0x50   : > { %p1483_p9 = pnand %p1482_p7, %p1476_p2 }
  0x52   : > { %1486 = shalt.err (!%p1483_p9)
}
  0x53   : > { %s1487_s12 = scalar_lea.vmem %s1759_s17, 2048  ;;  %s1578_s13 = smov [#allocation2]  }
  0x54   : > { %p1488_p12 = scmp.ne.s32.totalorder %s1759_s17, %s1487_s12  ;;  %s1492_s10 = sshll.u32 %s1578_s13, 4  ;;  %s1493_s10 = int_to_ptr.vmem [resolvable:$false] %s1492_s10 }
  0x55   : > { %s1494_s15 = scalar_lea.vmem %s1493_s10, 4096  ;;  %p1495_p4 = scmp.lt.s32.totalorder %s1759_s17, %s1493_s10 }
  0x56   : > { %p1490_p1 = pnand %p1488_p12, %p1474_p0  ;;  %p1496_p13 = scmp.lt.s32.totalorder %s1494_s15, %s1487_s12 }
  0x58   : > { %p1491_p5 = pneg %p1490_p1  ;;  %p1497_p6 = por %p1496_p13, %p1495_p4 }
  0x5a   : > { %p1498_p10 = pnand %p1497_p6, %p1491_p5 }
  0x5c   : > { %1501 = shalt.err (!%p1498_p10)
}
  0x5d   : > { %1286 = dma.hbm_to_vmem [thread:$0]  (!%p1761_p11), %s1757_s16, 2048, %s1759_s17, %s1765_s26, %s1576_s19, %s1576_s19, %s1577_s20  }
  0x5e   : > { %257 = sbr.rel (%p1658_p8) target bundleno = 826 (0x33a), region = 44  ;;  %s1799_s30 = sand.u32 (!%p1658_p8), 1, %s1564_s22  }
  0x5f   : > { %s1148_s14 = sshll.u32 (!%p1658_p8), %s1799_s30, 7  ;;  %s260_s7 = scalar_lea.sflag (!%p1658_p8), [#allocation3], %s1799_s30 }
  0x60   : > { %s1803_s12 = scalar_lea.vmem (!%p1658_p8), [#allocation2], %s1148_s14  ;;  %p2185_p4 = scmp.ne.s32.totalorder (!%p1658_p8), %s2178_s27, 0 }
  0x65   : > { %1547 = dma.done.wait (%p2185_p4), %s260_s7, 2048  }
  0x66   : > { %1549 = vsyncadd (%p2185_p4), %s260_s7, 4294965248  ;;  %p2186_p5 = scmp.eq.s32.totalorder %s1639_s25, 0 }
  0x68   : > { %1551 = dma.done.wait (%p2186_p5), [#allocation6], 1024   ;;  %p2187_p8 = pmov %p2186_p5 }
  0x69   : > { %vm328_vm0 = vcmask 261120   ;;  %v317_v0 = vld [vmem:[#allocation5] sm:$0xff]  ;;  %v318_v1 = vld [vmem:[#allocation5 + $0x8] sm:$0xff]  ;;  %v319_v2 = vld [vmem:[#allocation5 + $0x10] sm:$0xff]  ;;  %vm1580_vm1 = vmmov 0   ;;  %vm948_vm2 = vcmask 1041409  }
  0x6a   : > { %1553 = vsyncadd (%p2187_p8), [#allocation6], 4294966272  ;;  %v1246_v3 = vpack.c.bf16 %v318_v1, %v317_v0  ;;  %v320_v4 = vld [vmem:[#allocation5 + $0x18] sm:$0xff]  ;;  %v1814_v5 = vld [vmem:[%s1803_s12] sm:$0xff]  ;;  %vm950_vm3 = vcmask 1042434   ;;  %vm952_vm4 = vcmask 1043459  }
  0x6b   : > { %v1817_v6 = vld [vmem:[%s1803_s12 + $0x50] sm:$0xff]  ;;  %v1250_v7 = vpack.c.bf16 %v320_v4, %v319_v2  ;;  %1211 = vmatprep.mubr.msk.f32.mxu0 %vm328_vm0, %v1814_v5  ;;  %v1824_v8 = vld [vmem:[%s1803_s12 + $0x8] sm:$0xff]  ;;  %v1827_v9 = vld [vmem:[%s1803_s12 + $0x58] sm:$0xff]  ;;  %vm954_vm5 = vcmask 1044484   ;;  %vm956_vm6 = vcmask 1045509   ;;  %vm958_vm7 = vcmask 1046534  }
  0x6c   : > { %1226 = vmatprep.mubr.msk.f32.mxu1 %vm328_vm0, %v1817_v6  ;;  %1247 = vmatprep.subr.bf16.mxu0 %v1246_v3  ;;  %v1830_v10 = vld [vmem:[%s1803_s12 + $0x10] sm:$0xff]  ;;  %v1833_v11 = vld [vmem:[%s1803_s12 + $0x60] sm:$0xff]  ;;  %v1844_v12 = vld [vmem:[%s1803_s12 + $0x18] sm:$0xff]  ;;  %vm960_vm8 = vcmask 1047559   ;;  %s1151_s16 = sshll.u32 %s1799_s30, 3  ;;  %s1173_s26 = sshll.u32 %s1639_s25, 7 }
  0x6d   : > { %1260 = vmatprep.subr.bf16.mxu1 %v1246_v3  ;;  %1249 = vmatpush3.bf16.msra.mxu0 %v1246_v3  ;;  %v1847_v13 = vld [vmem:[%s1803_s12 + $0x68] sm:$0xff]  ;;  %v1850_v14 = vld [vmem:[%s1803_s12 + $0x20] sm:$0xff]  ;;  %v1853_v15 = vld [vmem:[%s1803_s12 + $0x70] sm:$0xff]  ;;  %s299_s13 = scalar_lea.vmem [#allocation8], %s1151_s16  ;;  %s2124_s7 = scalar_lea.hbm %s2174_s6, %s1173_s26 }
  0x6e   : > { %1262 = vmatpush3.bf16.msra.mxu1 %v1246_v3  ;;  %1251 = vmatprep.subr.bf16.mxu0 %v1250_v7  ;;  %v1862_v16 = vld [vmem:[%s1803_s12 + $0x28] sm:$0xff]  ;;  %v1867_v17 = vld [vmem:[%s1803_s12 + $0x78] sm:$0xff]  ;;  %v1870_v18 = vld [vmem:[%s1803_s12 + $0x30] sm:$0xff]  ;;  %s1049_s10 = sshll.u32 %s299_s13, 4  ;;  %p2188_p0 = scmp.ne.s32.totalorder %s2183_s9, 0  ;;  %s2126_s10 = int_to_ptr.vmem [resolvable:$true] %s1049_s10 }
  0x6f   : > { %1261 = vmatprep.subr.bf16.mxu1 %v1250_v7  ;;  %v1879_v19 = vld [vmem:[%s1803_s12 + $0x38] sm:$0xff]  ;;  %v1882_v20 = vld [vmem:[%s1803_s12 + $0x40] sm:$0xff]  ;;  %v1889_v21 = vld [vmem:[%s1803_s12 + $0x48] sm:$0xff]  ;;  %s1036_s12 = scalar_lea.sflag [#allocation4], %s1799_s30  ;;  %s1502_s27 = scalar_lea.vmem %s2126_s10, 128 }
  0x70   : > { %v1896_v22 = vld [vmem:[%s2170_s2] ss:$0 sm:$0xff]  ;;  %p1503_p11 = scmp.ne.s32.totalorder %s2126_s10, %s1502_s27  ;;  %s1582_s25 = smov [#allocation8]  }
  0x71   : > { %1253 = vmatpush3.bf16.msra.mxu0 %v1250_v7  ;;  %s1506_s29 = sshll.u32 %s1582_s25, 4  ;;  %s1507_s29 = int_to_ptr.vmem [resolvable:$false] %s1506_s29 }
  0x72   : > { %1263 = vmatpush3.bf16.msra.mxu1 %v1250_v7  ;;  %p1504_p2 = pnand %p1503_p11, %p2188_p0  ;;  %s1508_s19 = scalar_lea.vmem %s1507_s29, 256 }
  0x73   : > { %p1509_p7 = scmp.lt.s32.totalorder %s2126_s10, %s1507_s29  ;;  %p1510_p9 = scmp.lt.s32.totalorder %s1508_s19, %s1502_s27 }
  0x74   : > { %1212 = vmatmul.mubr.msk.f32.vlgmr.msra.gmra.mrb[0].mxu0 %vm328_vm0, %v1824_v8  ;;  %p1505_p3 = pneg %p1504_p2 }
  0x75   : > { %1227 = vmatmul.mubr.msk.f32.vlgmr.msra.gmra.mrb[0].mxu1 %vm328_vm0, %v1827_v9  ;;  %1214 = vmatprep.mubr.msk.f32.mxu0 %vm328_vm0, %v1830_v10  ;;  %p1511_p12 = por %p1510_p9, %p1509_p7 }
  0x76   : > { %1229 = vmatprep.mubr.msk.f32.mxu1 %vm328_vm0, %v1833_v11 }
  0x77   : > { %p1512_p1 = pnand %p1511_p12, %p1505_p3 }
  0x78   : > { %1215 = vmatmul.mubr.msk.f32.gmra.mrb[2].mxu0 %vm328_vm0, %v1844_v12 }
  0x79   : > { %1230 = vmatmul.mubr.msk.f32.gmra.mrb[2].mxu1 %vm328_vm0, %v1847_v13  ;;  %1217 = vmatprep.mubr.msk.f32.mxu0 %vm328_vm0, %v1850_v14 }
  0x7a   : > { %1232 = vmatprep.mubr.msk.f32.mxu1 %vm328_vm0, %v1853_v15 }
  0x7c   : > { %1218 = vmatmul.mubr.msk.f32.gmra.mrb[4].mxu0 %vm328_vm0, %v1862_v16 }
  0x7d   : > { %1233 = vmatmul.mubr.msk.f32.gmra.mrb[4].mxu1 %vm328_vm0, %v1867_v17  ;;  %1220 = vmatprep.mubr.msk.f32.mxu0 %vm328_vm0, %v1870_v18 }
  0x80   : > { %1221 = vmatmul.mubr.msk.f32.gmra.mrb[6].mxu0 %vm328_vm0, %v1879_v19 }
  0x81   : > { %1223 = vmatprep.mubr.msk.f32.mxu0 %vm328_vm0, %v1882_v20 }
  0x84   : > { %1224 = vmatmul.mubr.msk.f32.gmra.mrb[8].mxu0 %vm328_vm0, %v1889_v21 }
 0x147   : > { %v1213_v23 = vpop.f32.mrb[0].mxu0 }
 0x148   : > { %v1228_v24 = vpop.f32.mrb[0].mxu1  ;;  %v449_v25 = vadd.f32 %v1213_v23, %v1896_v22  ;;  %v443_v27 = vpop.f32.mrb[1].mxu0 }
 0x149   : > { %v499_v26 = vadd.f32 %v1228_v24, %v1896_v22  ;;  %v493_v28 = vpop.f32.mrb[1].mxu1  ;;  %v444_v29 = vadd.f32 %v1896_v22, %v443_v27  ;;  %v1940_v27 = vld [vmem:[%s2171_s3] ss:$0 sm:$0xff] }
 0x14a   : > { %v1902_v30 = vadd.f32 %v1896_v22, %v493_v28  ;;  %v539_v31 = vmul.f32 0.70710677, %v449_v25  ;;  %v523_v62 = vmul.f32 0.5, %v449_v25 }
 0x14b   : > { %v549_v32 = vmul.f32 0.70710677, %v499_v26  ;;  %v538_v33 = vmul.f32 0.70710677, %v444_v29  ;;  %v1216_v35 = vpop.f32.mrb[2].mxu0  ;;  %v533_v3 = vmul.f32 0.5, %v499_v26 }
 0x14c   : > { %v548_v34 = vmul.f32 0.70710677, %v1902_v30  ;;  %1336 = verf.f32 %v539_v31  ;;  %v1231_v36 = vpop.f32.mrb[2].mxu1  ;;  %v459_v37 = vadd.f32 %v1216_v35, %v1896_v22  ;;  %v453_v39 = vpop.f32.mrb[3].mxu0  ;;  %v522_v4 = vmul.f32 0.5, %v444_v29 }
 0x14d   : > { %1338 = verf.f32 %v549_v32  ;;  %v1907_v38 = vadd.f32 %v1231_v36, %v1896_v22  ;;  %v503_v40 = vpop.f32.mrb[3].mxu1  ;;  %v1910_v41 = vadd.f32 %v1896_v22, %v453_v39 }
 0x14e   : > { %1340 = verf.f32 %v538_v33  ;;  %v1913_v42 = vadd.f32 %v1896_v22, %v503_v40  ;;  %v541_v43 = vmul.f32 0.70710677, %v459_v37 }
 0x14f   : > { %1342 = verf.f32 %v548_v34  ;;  %v1219_v44 = vpop.f32.mrb[4].mxu0  ;;  %v551_v46 = vmul.f32 0.70710677, %v1907_v38  ;;  %v540_v47 = vmul.f32 0.70710677, %v1910_v41 }
 0x150   : > { %v1234_v45 = vpop.f32.mrb[4].mxu1  ;;  %1344 = verf.f32 %v541_v43  ;;  %v550_v48 = vmul.f32 0.70710677, %v1913_v42  ;;  %v1919_v49 = vadd.f32 %v1219_v44, %v1896_v22  ;;  %v463_v50 = vpop.f32.mrb[5].mxu0  ;;  %v525_v44 = vmul.f32 0.5, %v459_v37 }
 0x151   : > { %v513_v51 = vpop.f32.mrb[5].mxu1  ;;  %1346 = verf.f32 %v551_v46  ;;  %v1922_v52 = vadd.f32 %v1896_v22, %v463_v50  ;;  %v1946_v26 = vadd.f32 %v1234_v45, %v1896_v22  ;;  %v532_v50 = vmul.f32 0.5, %v1902_v30 }
 0x152   : > { %1348 = verf.f32 %v540_v47  ;;  %v543_v53 = vmul.f32 0.70710677, %v1919_v49  ;;  %v1949_v29 = vadd.f32 %v1896_v22, %v513_v51 }
 0x153   : > { %v1222_v54 = vpop.f32.mrb[6].mxu0  ;;  %1350 = verf.f32 %v550_v48  ;;  %v542_v55 = vmul.f32 0.70710677, %v1922_v52 }
 0x154   : > { %v1927_v56 = vadd.f32 %v1222_v54, %v1896_v22  ;;  %v473_v57 = vpop.f32.mrb[7].mxu0  ;;  %v553_v54 = vmul.f32 0.70710677, %v1946_v26 }
 0x155   : > { %v1930_v58 = vadd.f32 %v1896_v22, %v473_v57  ;;  %1352 = verf.f32 %v542_v55  ;;  %v552_v55 = vmul.f32 0.70710677, %v1949_v29 }
 0x156   : > { %v1337_v59 = vpop.eup %1336  ;;  %v545_v60 = vmul.f32 0.70710677, %v1927_v56  ;;  %1354 = verf.f32 %v543_v53 }
 0x157   : > { %v1339_v61 = vpop.eup %1338  ;;  %v544_v63 = vmul.f32 0.70710677, %v1930_v58  ;;  %v1225_v0 = vpop.f32.mrb[8].mxu0  ;;  %v571_v1 = vadd.f32 1.0, %v1337_v59 }
 0x158   : > { %v1341_v2 = vpop.eup %1340  ;;  %v1935_v7 = vadd.f32 %v1225_v0, %v1896_v22  ;;  %v483_v23 = vpop.f32.mrb[9].mxu0  ;;  %v581_v24 = vadd.f32 1.0, %v1339_v61  ;;  %1356 = verf.f32 %v545_v60  ;;  %v534_v0 = vmul.f32 0.5, %v1913_v42 }
 0x159   : > { %v1343_v28 = vpop.eup %1342  ;;  %v1943_v25 = vadd.f32 %v1896_v22, %v483_v23  ;;  %v587_v31 = vmul.f32 %v571_v1, %v523_v62  ;;  %v570_v32 = vadd.f32 1.0, %v1341_v2  ;;  %1358 = verf.f32 %v544_v63 }
 0x15a   : > { %v597_v33 = vmul.f32 %v581_v24, %v533_v3  ;;  %v1345_v34 = vpop.eup %1344  ;;  %v547_v35 = vmul.f32 0.70710677, %v1935_v7  ;;  %v580_v48 = vadd.f32 1.0, %v1343_v28  ;;  %v535_v22 = vmul.f32 0.5, %v1907_v38 }
 0x15b   : > { %v546_v36 = vmul.f32 0.70710677, %v1943_v25  ;;  %v610_v39 = vmul.f32 %v1940_v27, %v587_v31  ;;  %v586_v40 = vmul.f32 %v570_v32, %v522_v4  ;;  %v1347_v43 = vpop.eup %1346  ;;  %v573_v47 = vadd.f32 1.0, %v1345_v34 }
 0x15c   : > { %v620_v46 = vmul.f32 %v1940_v27, %v597_v33  ;;  %v1349_v45 = vpop.eup %1348  ;;  %v583_v51 = vadd.f32 1.0, %v1347_v43  ;;  %v596_v59 = vmul.f32 %v580_v48, %v532_v50  ;;  %v524_v1 = vmul.f32 0.5, %v1910_v41 }
 0x15d   : > { %627 = vadd.xlane.f32.xlu0 %v610_v39  ;;  %v1351_v53 = vpop.eup %1350  ;;  %1360 = verf.f32 %v546_v36  ;;  %v589_v57 = vmul.f32 %v573_v47, %v525_v44  ;;  %v609_v37 = vmul.f32 %v1940_v27, %v586_v40  ;;  %v572_v38 = vadd.f32 1.0, %v1349_v45 }
 0x15e   : > { %647 = vadd.xlane.f32.xlu1 %v620_v46  ;;  %1362 = verf.f32 %v547_v35  ;;  %v582_v60 = vadd.f32 1.0, %v1351_v53  ;;  %v599_v62 = vmul.f32 %v583_v51, %v535_v22  ;;  %v619_v3 = vmul.f32 %v1940_v27, %v596_v59 }
 0x15f   : > { %v1353_v61 = vpop.eup %1352  ;;  %v612_v30 = vmul.f32 %v1940_v27, %v589_v57  ;;  %1364 = verf.f32 %v552_v55  ;;  %v588_v31 = vmul.f32 %v572_v38, %v524_v1  ;;  %v526_v33 = vmul.f32 0.5, %v1922_v52  ;;  %v931_v1 = vld [vmem:[#allocation7 + $0x10] sm:$0xff] }
 0x160   : > { %v1355_v63 = vpop.eup %1354  ;;  %1366 = verf.f32 %v553_v54  ;;  %v598_v4 = vmul.f32 %v582_v60, %v534_v0  ;;  %v574_v23 = vadd.f32 1.0, %v1353_v61  ;;  %v622_v28 = vmul.f32 %v1940_v27, %v599_v62  ;;  %v930_v0 = vld [vmem:[#allocation7 + $0x8] sm:$0xff] }
 0x161   : > { %625 = vadd.xlane.f32.xlu0 %v609_v37  ;;  %v575_v32 = vadd.f32 1.0, %v1355_v63  ;;  %v527_v42 = vmul.f32 0.5, %v1919_v49  ;;  %v611_v39 = vmul.f32 %v1940_v27, %v588_v31  ;;  %v528_v46 = vmul.f32 0.5, %v1930_v58 }
 0x162   : > { %631 = vadd.xlane.f32.xlu1 %v612_v30  ;;  %v1357_v2 = vpop.eup %1356  ;;  %v621_v41 = vmul.f32 %v1940_v27, %v598_v4  ;;  %v590_v34 = vmul.f32 %v574_v23, %v526_v33  ;;  %v529_v47 = vmul.f32 0.5, %v1927_v56  ;;  %v530_v54 = vmul.f32 0.5, %v1943_v25  ;;  %v932_v4 = vld [vmem:[#allocation7 + $0x18] sm:$0xff] }
 0x163   : > { %v1359_v24 = vpop.eup %1358  ;;  %v591_v40 = vmul.f32 %v575_v32, %v527_v42  ;;  %v577_v43 = vadd.f32 1.0, %v1357_v2  ;;  %v531_v55 = vmul.f32 0.5, %v1935_v7  ;;  %v536_v58 = vmul.f32 0.5, %v1949_v29 }
 0x164   : > { %v576_v35 = vadd.f32 1.0, %v1359_v24  ;;  %v613_v52 = vmul.f32 %v1940_v27, %v590_v34  ;;  %v537_v59 = vmul.f32 0.5, %v1946_v26  ;;  %v929_v26 = vld [vmem:[#allocation7] sm:$0xff]  ;;  %v1579_v2 = vmov 0.0|0.0  }
 0x165   : > { %645 = vadd.xlane.f32.xlu0 %v619_v3  ;;  %v614_v50 = vmul.f32 %v1940_v27, %v591_v40  ;;  %v593_v22 = vmul.f32 %v577_v43, %v529_v47  ;;  %1254 = vmatprep.subr.bf16.mxu1 %v1579_v2  ;;  %v1255_v3 = vpack.c.bf16 %v930_v0, %v929_v26  ;;  %v1581_v23 = vmov 0.0  }
 0x166   : > { %651 = vadd.xlane.f32.xlu1 %v622_v28  ;;  %v592_v49 = vmul.f32 %v576_v35, %v528_v46  ;;  %1243 = vmatprep.mubr.msk.f32.mxu1 %vm1580_vm1, %v1581_v23  ;;  %v1258_v24 = vpack.c.bf16 %v932_v4, %v931_v1 }
 0x167   : > { %v1361_v36 = vpop.eup %1360  ;;  %v616_v60 = vmul.f32 %v1940_v27, %v593_v22  ;;  %1256 = vmatpush3.bf16.msra.mxu1 %v1255_v3 }
 0x168   : > { %v1363_v44 = vpop.eup %1362  ;;  %v578_v48 = vadd.f32 1.0, %v1361_v36  ;;  %v615_v56 = vmul.f32 %v1940_v27, %v592_v49  ;;  %1257 = vmatprep.subr.bf16.mxu1 %v1579_v2 }
 0x169   : > { %649 = vadd.xlane.f32.xlu0 %v621_v41  ;;  %v1365_v45 = vpop.eup %1364  ;;  %v579_v51 = vadd.f32 1.0, %v1363_v44 }
 0x16a   : > { %629 = vadd.xlane.f32.xlu1 %v611_v39  ;;  %v1367_v53 = vpop.eup %1366  ;;  %v594_v57 = vmul.f32 %v578_v48, %v530_v54  ;;  %v584_v37 = vadd.f32 1.0, %v1365_v45 }
 0x16b   : > { %v595_v61 = vmul.f32 %v579_v51, %v531_v55  ;;  %v585_v30 = vadd.f32 1.0, %v1367_v53  ;;  %1259 = vmatpush3.bf16.msra.mxu1 %v1258_v24 }
 0x16c   : > { %v617_v25 = vmul.f32 %v1940_v27, %v594_v57  ;;  %v600_v62 = vmul.f32 %v584_v37, %v536_v58 }
 0x16d   : > { %633 = vadd.xlane.f32.xlu0 %v613_v52  ;;  %v618_v7 = vmul.f32 %v1940_v27, %v595_v61  ;;  %v601_v38 = vmul.f32 %v585_v30, %v537_v59 }
 0x16e   : > { %635 = vadd.xlane.f32.xlu1 %v614_v50  ;;  %v623_v29 = vmul.f32 %v1940_v27, %v600_v62 }
 0x16f   : > { %v624_v63 = vmul.f32 %v1940_v27, %v601_v38 }
 0x171   : > { %637 = vadd.xlane.f32.xlu0 %v615_v56 }
 0x172   : > { %639 = vadd.xlane.f32.xlu1 %v616_v60 }
 0x175   : > { %641 = vadd.xlane.f32.xlu0 %v617_v25 }
 0x176   : > { %643 = vadd.xlane.f32.xlu1 %v618_v7 }
 0x179   : > { %653 = vadd.xlane.f32.xlu0 %v623_v29 }
 0x17a   : > { %655 = vadd.xlane.f32.xlu1 %v624_v63 }
 0x1ea   : > { %v628_v28 = vpop.xlane.xlu0 %627 }
 0x1eb   : > { %v648_v31 = vpop.xlane.xlu1 %647 }
 0x1ee   : > { %v626_v32 = vpop.xlane.xlu0 %625 }
 0x1ef   : > { %v1983_v27 = vpop.xlane.xlu1 %631  ;;  %v657_v33 = vmax.f32 %v626_v32, %v628_v28 }
 0x1f1   : > { %v658_v42 = vrot.slane %v657_v33, 4 }
 0x1f2   : > { %v646_v41 = vpop.xlane.xlu0 %645 }
 0x1f3   : > { %v659_v34 = vmax.f32 %v657_v33, %v658_v42  ;;  %v652_v35 = vpop.xlane.xlu1 %651  ;;  %v692_v36 = vmax.f32 %v646_v41, %v648_v31 }
 0x1f5   : > { %v660_v39 = vrot.slane %v659_v34, 2  ;;  %v693_v40 = vrot.slane %v692_v36, 4 }
 0x1f6   : > { %v650_v43 = vpop.xlane.xlu0 %649 }
 0x1f7   : > { %v661_v44 = vmax.f32 %v659_v34, %v660_v39  ;;  %v694_v46 = vmax.f32 %v692_v36, %v693_v40  ;;  %v630_v47 = vpop.xlane.xlu1 %629  ;;  %v699_v52 = vmax.f32 %v650_v43, %v652_v35 }
 0x1f8   : > { %v664_v49 = vmax.f32 %v630_v47, %v1983_v27 }
 0x1f9   : > { %v662_v48 = vrot.slane %v661_v44, 1  ;;  %v695_v45 = vrot.slane %v694_v46, 2  ;;  %v700_v50 = vrot.slane %v699_v52, 4 }
 0x1fa   : > { %v665_v22 = vrot.slane %v664_v49, 4  ;;  %v1986_v51 = vpop.xlane.xlu0 %633 }
 0x1fb   : > { %v663_v53 = vmax.f32 %v661_v44, %v662_v48  ;;  %v696_v54 = vmax.f32 %v694_v46, %v695_v45  ;;  %v701_v55 = vmax.f32 %v699_v52, %v700_v50  ;;  %v1988_v58 = vpop.xlane.xlu1 %635 }
 0x1fc   : > { %v666_v56 = vmax.f32 %v664_v49, %v665_v22  ;;  %v671_v57 = vmax.f32 %v1986_v51, %v1988_v58 }
 0x1fd   : > { %v713_v37 = vsub.f32 %v626_v32, %v663_v53  ;;  %v714_v59 = vsub.f32 %v628_v28, %v663_v53  ;;  %v697_v60 = vrot.slane %v696_v54, 1  ;;  %v702_v61 = vrot.slane %v701_v55, 2 }
 0x1fe   : > { %v667_v30 = vrot.slane %v666_v56, 2  ;;  %v672_v25 = vrot.slane %v671_v57, 4  ;;  %v1992_v62 = vpop.xlane.xlu0 %637 }
 0x1ff   : > { %v729_v7 = vmul.f32 1.442695, %v713_v37  ;;  %v731_v38 = vmul.f32 1.442695, %v714_v59  ;;  %v698_v29 = vmax.f32 %v696_v54, %v697_v60  ;;  %v703_v63 = vmax.f32 %v701_v55, %v702_v61  ;;  %v1994_v26 = vpop.xlane.xlu1 %639 }
 0x200   : > { %v668_v0 = vmax.f32 %v666_v56, %v667_v30  ;;  %v673_v1 = vmax.f32 %v671_v57, %v672_v25  ;;  %v678_v2 = vmax.f32 %v1992_v62, %v1994_v26 }
 0x201   : > { %1368 = vpow2.f32 %v729_v7  ;;  %v723_v3 = vsub.f32 %v646_v41, %v698_v29  ;;  %v724_v4 = vsub.f32 %v648_v31, %v698_v29  ;;  %v704_v23 = vrot.slane %v703_v63, 1 }
 0x202   : > { %1370 = vpow2.f32 %v731_v38  ;;  %v669_v24 = vrot.slane %v668_v0, 1  ;;  %v674_v28 = vrot.slane %v673_v1, 2  ;;  %v679_v32 = vrot.slane %v678_v2, 4  ;;  %v1998_v33 = vpop.xlane.xlu0 %641 }
 0x203   : > { %v749_v42 = vmul.f32 1.442695, %v723_v3  ;;  %v751_v34 = vmul.f32 1.442695, %v724_v4  ;;  %v705_v36 = vmax.f32 %v703_v63, %v704_v23  ;;  %v2000_v39 = vpop.xlane.xlu1 %643 }
 0x204   : > { %v670_v40 = vmax.f32 %v668_v0, %v669_v24  ;;  %v675_v44 = vmax.f32 %v673_v1, %v674_v28  ;;  %v680_v46 = vmax.f32 %v678_v2, %v679_v32  ;;  %v685_v52 = vmax.f32 %v1998_v33, %v2000_v39 }
 0x205   : > { %1372 = vpow2.f32 %v749_v42  ;;  %v725_v31 = vsub.f32 %v650_v43, %v705_v36  ;;  %v726_v41 = vsub.f32 %v652_v35, %v705_v36 }
 0x206   : > { %1374 = vpow2.f32 %v751_v34  ;;  %v715_v49 = vsub.f32 %v630_v47, %v670_v40  ;;  %v716_v48 = vsub.f32 %v1983_v27, %v670_v40  ;;  %v676_v45 = vrot.slane %v675_v44, 1  ;;  %v2005_v50 = vpop.xlane.xlu0 %653 }
 0x207   : > { %v753_v22 = vmul.f32 1.442695, %v725_v31  ;;  %v755_v53 = vmul.f32 1.442695, %v726_v41  ;;  %v681_v54 = vrot.slane %v680_v46, 2  ;;  %v686_v55 = vrot.slane %v685_v52, 4  ;;  %v2007_v56 = vpop.xlane.xlu1 %655 }
 0x208   : > { %v733_v57 = vmul.f32 1.442695, %v715_v49  ;;  %v735_v37 = vmul.f32 1.442695, %v716_v48  ;;  %v677_v59 = vmax.f32 %v675_v44, %v676_v45  ;;  %v706_v43 = vmax.f32 %v2005_v50, %v2007_v56 }
 0x209   : > { %1376 = vpow2.f32 %v753_v22  ;;  %v682_v35 = vmax.f32 %v680_v46, %v681_v54  ;;  %v687_v47 = vmax.f32 %v685_v52, %v686_v55 }
 0x20a   : > { %1378 = vpow2.f32 %v733_v57  ;;  %v717_v27 = vsub.f32 %v1986_v51, %v677_v59  ;;  %v718_v60 = vsub.f32 %v1988_v58, %v677_v59  ;;  %v707_v61 = vrot.slane %v706_v43, 4 }
 0x20b   : > { %v2013_v30 = vpop.eup %1368  ;;  %1380 = vpow2.f32 %v735_v37  ;;  %v683_v25 = vrot.slane %v682_v35, 1  ;;  %v688_v7 = vrot.slane %v687_v47, 2 }
 0x20c   : > { %v2015_v38 = vpop.eup %1370  ;;  %1382 = vpow2.f32 %v755_v53  ;;  %v737_v29 = vmul.f32 1.442695, %v717_v27  ;;  %v739_v63 = vmul.f32 1.442695, %v718_v60  ;;  %v708_v0 = vmax.f32 %v706_v43, %v707_v61 }
 0x20d   : > { %v761_v1 = vadd.f32 %v2015_v38, %v2013_v30  ;;  %v684_v2 = vmax.f32 %v682_v35, %v683_v25  ;;  %v689_v3 = vmax.f32 %v687_v47, %v688_v7 }
 0x20e   : > { %1384 = vpow2.f32 %v737_v29  ;;  %v709_v51 = vrot.slane %v708_v0, 2 }
 0x20f   : > { %v2019_v58 = vpop.eup %1372  ;;  %v762_v4 = vrot.slane %v761_v1, 4  ;;  %1386 = vpow2.f32 %v739_v63  ;;  %v719_v23 = vsub.f32 %v1992_v62, %v684_v2  ;;  %v720_v24 = vsub.f32 %v1994_v26, %v684_v2 }
 0x210   : > { %v2023_v28 = vpop.eup %1374  ;;  %v690_v32 = vrot.slane %v689_v3, 1  ;;  %v710_v42 = vmax.f32 %v708_v0, %v709_v51 }
 0x211   : > { %v763_v34 = vadd.f32 %v762_v4, %v761_v1  ;;  %v796_v36 = vadd.f32 %v2023_v28, %v2019_v58  ;;  %v741_v40 = vmul.f32 1.442695, %v719_v23  ;;  %v743_v44 = vmul.f32 1.442695, %v720_v24 }
 0x212   : > { %v691_v46 = vmax.f32 %v689_v3, %v690_v32  ;;  %v711_v52 = vrot.slane %v710_v42, 1 }
 0x213   : > { %v2027_v31 = vpop.eup %1376  ;;  %v764_v41 = vrot.slane %v763_v34, 2  ;;  %v797_v49 = vrot.slane %v796_v36, 4  ;;  %1388 = vpow2.f32 %v741_v40 }
 0x214   : > { %v2029_v62 = vpop.eup %1378  ;;  %1390 = vpow2.f32 %v743_v44  ;;  %v721_v26 = vsub.f32 %v1998_v33, %v691_v46  ;;  %v722_v48 = vsub.f32 %v2000_v39, %v691_v46  ;;  %v712_v45 = vmax.f32 %v710_v42, %v711_v52 }
 0x215   : > { %v2033_v22 = vpop.eup %1380  ;;  %v765_v53 = vadd.f32 %v764_v41, %v763_v34  ;;  %v798_v54 = vadd.f32 %v797_v49, %v796_v36 }
 0x216   : > { %v2035_v55 = vpop.eup %1382  ;;  %v768_v57 = vadd.f32 %v2033_v22, %v2029_v62  ;;  %v745_v37 = vmul.f32 1.442695, %v721_v26  ;;  %v747_v59 = vmul.f32 1.442695, %v722_v48  ;;  %v727_v43 = vsub.f32 %v2005_v50, %v712_v45 }
 0x217   : > { %v766_v35 = vrot.slane %v765_v53, 1  ;;  %v799_v47 = vrot.slane %v798_v54, 2  ;;  %v803_v33 = vadd.f32 %v2035_v55, %v2027_v31  ;;  %v728_v39 = vsub.f32 %v2007_v56, %v712_v45 }
 0x218   : > { %v2043_v27 = vpop.eup %1384  ;;  %v769_v60 = vrot.slane %v768_v57, 4  ;;  %1392 = vpow2.f32 %v745_v37  ;;  %v757_v61 = vmul.f32 1.442695, %v727_v43 }
 0x219   : > { %v2045_v25 = vpop.eup %1386  ;;  %v767_v7 = vadd.f32 %v766_v35, %v765_v53  ;;  %v800_v29 = vadd.f32 %v799_v47, %v798_v54  ;;  %v804_v63 = vrot.slane %v803_v33, 4  ;;  %1394 = vpow2.f32 %v747_v59 }
 0x21a   : > { %v770_v0 = vadd.f32 %v769_v60, %v768_v57  ;;  %v775_v50 = vadd.f32 %v2045_v25, %v2043_v27  ;;  %1396 = vpow2.f32 %v757_v61  ;;  %v759_v1 = vmul.f32 1.442695, %v728_v39 }
 0x21b   : > { %1398 = vrcp.f32 %v767_v7  ;;  %v801_v2 = vrot.slane %v800_v29, 1  ;;  %v805_v56 = vadd.f32 %v804_v63, %v803_v33 }
 0x21c   : > { %v771_v3 = vrot.slane %v770_v0, 2  ;;  %v776_v51 = vrot.slane %v775_v50, 4  ;;  %1400 = vpow2.f32 %v759_v1 }
 0x21d   : > { %v2049_v4 = vpop.eup %1388  ;;  %v802_v23 = vadd.f32 %v801_v2, %v800_v29  ;;  %v806_v24 = vrot.slane %v805_v56, 2 }
 0x21e   : > { %v2051_v32 = vpop.eup %1390  ;;  %v772_v42 = vadd.f32 %v771_v3, %v770_v0  ;;  %v777_v34 = vadd.f32 %v776_v51, %v775_v50 }
 0x21f   : > { %v807_v36 = vadd.f32 %v806_v24, %v805_v56  ;;  %v782_v40 = vadd.f32 %v2051_v32, %v2049_v4  ;;  %1402 = vrcp.f32 %v802_v23 }
 0x220   : > { %v773_v44 = vrot.slane %v772_v42, 1  ;;  %v778_v46 = vrot.slane %v777_v34, 2 }
 0x221   : > { %v808_v52 = vrot.slane %v807_v36, 1  ;;  %v783_v41 = vrot.slane %v782_v40, 4 }
 0x222   : > { %v2055_v49 = vpop.eup %1392  ;;  %v774_v26 = vadd.f32 %v773_v44, %v772_v42  ;;  %v779_v48 = vadd.f32 %v778_v46, %v777_v34 }
 0x223   : > { %v2057_v45 = vpop.eup %1394  ;;  %v809_v53 = vadd.f32 %v808_v52, %v807_v36  ;;  %v784_v54 = vadd.f32 %v783_v41, %v782_v40 }
 0x224   : > { %v2059_v57 = vpop.eup %1396  ;;  %1404 = vrcp.f32 %v774_v26  ;;  %v780_v37 = vrot.slane %v779_v48, 1  ;;  %v789_v59 = vadd.f32 %v2057_v45, %v2055_v49 }
 0x225   : > { %v1399_v43 = vpop.eup %1398  ;;  %1406 = vrcp.f32 %v809_v53  ;;  %v785_v35 = vrot.slane %v784_v54, 2 }
 0x226   : > { %v2063_v47 = vpop.eup %1400  ;;  %v781_v33 = vadd.f32 %v780_v37, %v779_v48  ;;  %v790_v39 = vrot.slane %v789_v59, 4  ;;  %v825_v7 = vmul.f32 %v1399_v43, %v2013_v30  ;;  %v826_v63 = vmul.f32 %v1399_v43, %v2015_v38 }
 0x227   : > { %v786_v60 = vadd.f32 %v785_v35, %v784_v54  ;;  %v810_v61 = vadd.f32 %v2063_v47, %v2059_v57 }
 0x228   : > { %1408 = vrcp.f32 %v781_v33  ;;  %v791_v29 = vadd.f32 %v790_v39, %v789_v59  ;;  %v841_v51 = vmul.f32 %v825_v7, %v1814_v5  ;;  %v842_v23 = vmul.f32 %v826_v63, %v1824_v8 }
 0x229   : > { %v787_v0 = vrot.slane %v786_v60, 1  ;;  %v811_v50 = vrot.slane %v810_v61, 4  ;;  %v1403_v1 = vpop.eup %1402 }
 0x22a   : > { %v792_v56 = vrot.slane %v791_v29, 2  ;;  %v835_v30 = vmul.f32 %v1403_v1, %v2019_v58  ;;  %v836_v36 = vmul.f32 %v1403_v1, %v2023_v28  ;;  %v857_v8 = vsel %vm328_vm0, %v841_v51, 0.0 }
 0x22b   : > { %v788_v2 = vadd.f32 %v787_v0, %v786_v60  ;;  %v812_v3 = vadd.f32 %v811_v50, %v810_v61  ;;  %v858_v26 = vsel %vm328_vm0, %v842_v23, 0.0 }
 0x22c   : > { %v793_v24 = vadd.f32 %v792_v56, %v791_v29  ;;  %v851_v53 = vmul.f32 %v835_v30, %v1817_v6  ;;  %v859_v35 = vadd.f32 %v858_v26, %v857_v8 }
 0x22d   : > { %1410 = vrcp.f32 %v788_v2  ;;  %v813_v42 = vrot.slane %v812_v3, 2 }
 0x22e   : > { %v1405_v34 = vpop.eup %1404  ;;  %v794_v5 = vrot.slane %v793_v24, 1  ;;  %v902_v6 = vsel %vm328_vm0, %v851_v53, 0.0  ;;  %v860_v63 = vrot.slane %v859_v35, 4 }
 0x22f   : > { %v1407_v40 = vpop.eup %1406  ;;  %v827_v38 = vmul.f32 %v1405_v34, %v2029_v62  ;;  %v828_v44 = vmul.f32 %v1405_v34, %v2033_v22  ;;  %v814_v41 = vadd.f32 %v813_v42, %v812_v3  ;;  %v852_v62 = vmul.f32 %v836_v36, %v1827_v9 }
 0x230   : > { %v837_v46 = vmul.f32 %v1407_v40, %v2027_v31  ;;  %v838_v52 = vmul.f32 %v1407_v40, %v2035_v55  ;;  %v795_v22 = vadd.f32 %v794_v5, %v793_v24  ;;  %v861_v24 = vadd.f32 %v860_v63, %v859_v35 }
 0x231   : > { %v843_v48 = vmul.f32 %v827_v38, %v1830_v10  ;;  %v844_v58 = vmul.f32 %v828_v44, %v1844_v12  ;;  %v815_v54 = vrot.slane %v814_v41, 1  ;;  %v903_v60 = vsel %vm328_vm0, %v852_v62, 0.0 }
 0x232   : > { %v1409_v28 = vpop.eup %1408  ;;  %v853_v37 = vmul.f32 %v837_v46, %v1833_v11  ;;  %v854_v59 = vmul.f32 %v838_v52, %v1847_v13  ;;  %1412 = vrcp.f32 %v795_v22  ;;  %v904_v0 = vadd.f32 %v903_v60, %v902_v6 }
 0x233   : > { %v866_v31 = vsel %vm328_vm0, %v843_v48, 0.0  ;;  %v867_v55 = vsel %vm328_vm0, %v844_v58, 0.0  ;;  %v829_v10 = vmul.f32 %v1409_v28, %v2043_v27  ;;  %v830_v12 = vmul.f32 %v1409_v28, %v2045_v25 }
 0x234   : > { %v868_v43 = vadd.f32 %v867_v55, %v866_v31  ;;  %v816_v33 = vadd.f32 %v815_v54, %v814_v41  ;;  %v911_v61 = vsel %vm328_vm0, %v853_v37, 0.0  ;;  %v912_v11 = vsel %vm328_vm0, %v854_v59, 0.0 }
 0x235   : > { %v845_v9 = vmul.f32 %v829_v10, %v1850_v14  ;;  %v846_v13 = vmul.f32 %v830_v12, %v1862_v16  ;;  %v913_v56 = vadd.f32 %v912_v11, %v911_v61  ;;  %v862_v46 = vrot.slane %v861_v24, 2 }
 0x236   : > { %v869_v7 = vrot.slane %v868_v43, 4  ;;  %1414 = vrcp.f32 %v816_v33 }
 0x237   : > { %v1411_v39 = vpop.eup %1410  ;;  %v875_v27 = vsel %vm328_vm0, %v845_v9, 0.0  ;;  %v876_v14 = vsel %vm328_vm0, %v846_v13, 0.0  ;;  %v914_v30 = vrot.slane %v913_v56, 4  ;;  %v863_v54 = vadd.f32 %v862_v46, %v861_v24 }
 0x238   : > { %v831_v25 = vmul.f32 %v1411_v39, %v2049_v4  ;;  %v832_v29 = vmul.f32 %v1411_v39, %v2051_v32  ;;  %v877_v50 = vadd.f32 %v876_v14, %v875_v27  ;;  %v870_v3 = vadd.f32 %v869_v7, %v868_v43 }
 0x239   : > { %v905_v32 = vrot.slane %v904_v0, 4  ;;  %v915_v48 = vadd.f32 %v914_v30, %v913_v56  ;;  %v864_v6 = vrot.slane %v863_v54, 1 }
 0x23a   : > { %v847_v1 = vmul.f32 %v831_v25, %v1870_v18  ;;  %v848_v2 = vmul.f32 %v832_v29, %v1879_v19  ;;  %v878_v16 = vrot.slane %v877_v50, 4  ;;  %v871_v40 = vrot.slane %v870_v3, 2 }
 0x23b   : > { %v906_v52 = vadd.f32 %v905_v32, %v904_v0  ;;  %v916_v59 = vrot.slane %v915_v48, 2 }
 0x23c   : > { %v884_v51 = vsel %vm328_vm0, %v847_v1, 0.0  ;;  %v885_v23 = vsel %vm328_vm0, %v848_v2, 0.0  ;;  %v879_v42 = vadd.f32 %v878_v16, %v877_v50  ;;  %v1413_v34 = vpop.eup %1412  ;;  %v872_v58 = vadd.f32 %v871_v40, %v870_v3 }
 0x23d   : > { %v886_v4 = vadd.f32 %v885_v23, %v884_v51  ;;  %v833_v38 = vmul.f32 %v1413_v34, %v2055_v49  ;;  %v834_v18 = vmul.f32 %v1413_v34, %v2057_v45  ;;  %v907_v55 = vrot.slane %v906_v52, 2  ;;  %v1170_v34 = vld [vmem:[%s2173_s5] ss:$0 sm:$0xff] }
 0x23e   : > { %v880_v19 = vrot.slane %v879_v42, 2  ;;  %v873_v43 = vrot.slane %v872_v58, 1  ;;  %v917_v60 = vadd.f32 %v916_v59, %v915_v48 }
 0x23f   : > { %v887_v36 = vrot.slane %v886_v4, 4  ;;  %v849_v5 = vmul.f32 %v833_v38, %v1882_v20  ;;  %v850_v41 = vmul.f32 %v834_v18, %v1889_v21 }
 0x240   : > { %v1415_v8 = vpop.eup %1414  ;;  %v881_v62 = vadd.f32 %v880_v19, %v879_v42  ;;  %v874_v61 = vadd.f32 %v873_v43, %v872_v58  ;;  %v918_v63 = vrot.slane %v917_v60, 1 }
 0x241   : > { %v888_v44 = vadd.f32 %v887_v36, %v886_v4  ;;  %v893_v28 = vsel %vm328_vm0, %v849_v5, 0.0  ;;  %v894_v53 = vsel %vm328_vm0, %v850_v41, 0.0  ;;  %v839_v49 = vmul.f32 %v1415_v8, %v2059_v57 }
 0x242   : > { %v895_v45 = vadd.f32 %v894_v53, %v893_v28  ;;  %v840_v22 = vmul.f32 %v1415_v8, %v2063_v47  ;;  %v882_v35 = vrot.slane %v881_v62, 1  ;;  %v908_v47 = vadd.f32 %v907_v55, %v906_v52 }
 0x243   : > { %v889_v26 = vrot.slane %v888_v44, 2  ;;  %v855_v20 = vmul.f32 %v839_v49, %v1853_v15  ;;  %v919_v16 = vadd.f32 %v918_v63, %v917_v60 }
 0x244   : > { %v896_v21 = vrot.slane %v895_v45, 4  ;;  %v856_v37 = vmul.f32 %v840_v22, %v1867_v17  ;;  %v883_v11 = vadd.f32 %v882_v35, %v881_v62  ;;  %v865_v17 = vadd.f32 %v864_v6, %v863_v54 }
 0x245   : > { %v890_v31 = vadd.f32 %v889_v26, %v888_v44  ;;  %v920_v10 = vsel %vm328_vm0, %v855_v20, 0.0  ;;  %v909_v27 = vrot.slane %v908_v47, 1 }
 0x246   : > { %v897_v12 = vadd.f32 %v896_v21, %v895_v45  ;;  %v921_v57 = vsel %vm328_vm0, %v856_v37, 0.0  ;;  %v949_v0 = vsel %vm948_vm2, %v874_v61, %v865_v17 }
 0x247   : > { %v922_v9 = vadd.f32 %v921_v57, %v920_v10  ;;  %v891_v33 = vrot.slane %v890_v31, 1  ;;  %v951_v1 = vsel %vm950_vm3, %v883_v11, %v949_v0  ;;  %v910_v2 = vadd.f32 %v909_v27, %v908_v47 }
 0x248   : > { %v898_v39 = vrot.slane %v897_v12, 2 }
 0x249   : > { %v923_v15 = vrot.slane %v922_v9, 4  ;;  %v892_v7 = vadd.f32 %v891_v33, %v890_v31 }
 0x24a   : > { %v899_v13 = vadd.f32 %v898_v39, %v897_v12 }
 0x24b   : > { %v924_v25 = vadd.f32 %v923_v15, %v922_v9  ;;  %v953_v3 = vsel %vm952_vm4, %v892_v7, %v951_v1 }
 0x24c   : > { %v900_v29 = vrot.slane %v899_v13, 1 }
 0x24d   : > { %v925_v14 = vrot.slane %v924_v25, 2 }
 0x24e   : > { %v901_v50 = vadd.f32 %v900_v29, %v899_v13 }
 0x24f   : > { %v926_v56 = vadd.f32 %v925_v14, %v924_v25 }
 0x250   : > { %v955_v51 = vsel %vm954_vm5, %v901_v50, %v953_v3 }
 0x251   : > { %v927_v23 = vrot.slane %v926_v56, 1  ;;  %v957_v4 = vsel %vm956_vm6, %v910_v2, %v955_v51 }
 0x252   : > { %v959_v24 = vsel %vm958_vm7, %v919_v16, %v957_v4 }
 0x253   : > { %v928_v32 = vadd.f32 %v927_v23, %v926_v56 }
 0x255   : > { %v961_v42 = vsel %vm960_vm8, %v928_v32, %v959_v24 }
 0x256   : > { %1244 = vmatmul.mubr.msk.f32.vlgmr.msra.gmra.mrb[6].mxu1 %vm328_vm0, %v961_v42 }
 0x329   : > { %v1030_v30 = vpop.f32.mrb[6].mxu1 }
 0x32a   : > { %v1031_v36 = vadd.f32 %v1170_v34, %v1030_v30  ;;  %v1245_v40 = vpop.f32.mrb[7].mxu1 }
 0x32c   : > { %1034 = vst [vmem:[%s299_s13] sm:$0xff] %v1031_v36 }
 0x32d   : > { %1515 = shalt.err (!%p1512_p1)
}
 0x32e   : > { %s1516_s30 = scalar_lea.hbm %s2124_s7, 128  ;;  %s1520_s17 = scalar_lea.hbm %s2174_s6, 256 }
 0x32f   : > { %p1517_p13 = scmp.ne.s32.totalorder %s2124_s7, %s1516_s30  ;;  %p1521_p4 = scmp.lt.u32.totalorder %s2124_s7, %s2174_s6 }
 0x330   : > { %p1522_p5 = scmp.lt.u32.totalorder %s1520_s17, %s1516_s30  ;;  %p1524_p11 = scmp.lt.u32.totalorder %s1516_s30, %s2124_s7 }
 0x331   : > { %p1518_p6 = pnand %p1517_p13, %p2188_p0 }
 0x332   : > { %p1523_p8 = por %p1522_p5, %p1521_p4 }
 0x333   : > { %p1519_p10 = pneg %p1518_p6 }
 0x334   : > { %p1525_p2 = por %p1524_p11, %p1523_p8 }
 0x336   : > { %p1526_p3 = pnand %p1525_p2, %p1519_p10 }
 0x338   : > { %1529 = shalt.err (!%p1526_p3)
}
 0x339   : > { %1274 = dma.vmem_to_hbm [thread:$0]  (%p2188_p0), %s2126_s10, 128, %s2124_s7, %s1036_s12  }
 0x33a PF: > { %s1061_s13 = sand.u32 1, %s1560_s21   ;;  %p2189_p7 = scmp.ne.s32.totalorder %s2179_s28, 0 }
 0x33b   : > { %p2190_p9 = scmp.ge.s32.totalorder %s1572_s24, 2  ;;  %s1062_s15 = scalar_lea.sflag [#allocation4], %s1061_s13 }
 0x33d   : > { %p1288_p12 = pnand %p2190_p9, %p2189_p7 }
 0x33f   : > { %1555 = dma.done.wait (!%p1288_p12), %s1062_s15, 128  }
 0x340   : > { %1557 = vsyncadd (!%p1288_p12), %s1062_s15, 4294967168  ;;  %p20_p1 = scmp.ge.s32.totalorder %s1734_s8, 4   ;;  %s2191_s21 = smov %s1564_s22 }
 0x341   : > { %s2192_s22 = smov %s1568_s23  ;;  %s2193_s23 = smov %s1750_s11 }
 0x342   : > { %s2194_s24 = smov %s1734_s8  ;;  %22 = sbr.rel (!%p20_p1) target bundleno = 6 (0x6), region = 97 }
 0x349   :  { %1067 = vsyncpa [#allocation3], 1 }
 0x34a   :  { %1069 = vsyncpa [#allocation3 + $0x1], 1 }
 0x34b   :  { %1070 = vsyncpa [#allocation6], 1 }
 0x34c   :  { %1071 = vsyncpa [#allocation4], 1 }
 0x34d   :  { %1073 = vsyncpa [#allocation4 + $0x1], 1 }

</bundles_post_ra>
